<compile_context>
chip_gen: v7x
topology: tpu7x:2x2x1
jax: 0.10.0
libtpu: 0.0.40
codegen_flags: <defaults>
</compile_context>

<pallas_src>
import jax
import jax.numpy as jnp
import numpy as np
from jax.experimental import pallas as pl
from jax.experimental.pallas import tpu as pltpu

EPS = 1e-6  # LayerNorm2d eps (SAM default)


# ---------------------------------------------------------------------------
# Kernels
# ---------------------------------------------------------------------------
def _make_compute_kernel(fuse_gate: bool, c4: int):
    """Pass 1: fused ConvT(2,2) + LayerNorm2d + ReLU (+ in-place SE gate if single tile).

    Refs:
      x_ref      (1, tile, Cin)
      wcat_ref   (Cin, 4*Cout)     conv weights, 4 sub-pixel positions concatenated on lanes
      bcat_ref   (1, 4*Cout)       conv bias tiled x4
      lnw_ref    (1, 4*Cout)       LN gamma tiled x4
      lnb_ref    (1, 4*Cout)       LN beta  tiled x4
      gmean2_ref (2*4*Cout, 8)     blockdiag group-averaging matrix (mean & 2nd moment)
      gexp2_ref  (8, 2*4*Cout)     blockdiag group -> channel broadcast matrix
      w1_ref     (4*Cout, Cred)    SE fc1^T tiled x4 and pre-scaled by 1/(4*HW)
      w2_ref     (Cred, 4*Cout)    SE fc2^T tiled x4
      y_ref      (1, tile, 4*Cout) output block (lane-dense; f32 or bf16)
      gate_ref   (1, 1, 4*Cout)    per-image SE gate (used by the rescale pass)
      pooled     (1, 4*Cout)       VMEM scratch: running SE pool across HW tiles
    """

    def kernel(x_ref, wcat_ref, bcat_ref, lnw_ref, lnb_ref, gmean2_ref, gexp2_ref,
               w1_ref, w2_ref, y_ref, gate_ref, pooled):
        t = pl.program_id(1)

        @pl.when(t == 0)
        def _():
            pooled[...] = jnp.zeros_like(pooled)

        # ConvTranspose2d(k=2, s=2): one fused MXU matmul for all 4 sub-pixel positions.
        x = x_ref[0]                                                    # (tile, Cin)
        y = jnp.dot(x, wcat_ref[...], preferred_element_type=jnp.float32)
        y = y + bcat_ref[...]                                           # (tile, 4C)

        # LayerNorm2d per-pixel channel stats on the MXU, fused to two matmuls:
        #   [y | y*y] @ blockdiag(G, G) -> (tile, 8)   = [mean4 | E[y^2]_4]
        #   (tile, 8) @ blockdiag(E, E) -> (tile, 2*c4) = [mean | E[y^2]] per channel.
        y2 = jnp.concatenate([y, y * y], axis=-1)                              # (tile, 2*c4)
        stats = jnp.dot(y2, gmean2_ref[...], preferred_element_type=jnp.float32)   # (tile, 8)
        urm = jnp.dot(stats, gexp2_ref[...], preferred_element_type=jnp.float32)   # (tile, 2*c4)
        u = urm[:, :c4]
        m2 = urm[:, c4:]
        # NOTE: single-pass var = E[y^2] - E[y]^2, guarded against going negative.
        # Fine for this module's f32 conv outputs; switch to a centered second pass if a
        # use case shows |mean| >> std.
        rstd = jax.lax.rsqrt(jnp.maximum(m2 - u * u, 0.0) + EPS)
        yr = jnp.maximum((y - u) * rstd * lnw_ref[...] + lnb_ref[...], 0.0)    # ReLU

        # SE global-average-pool partial sum (accumulates across the HW tile axis).
        pooled[...] += jnp.sum(yr, axis=0, keepdims=True)

        # Stream the activation straight into the output block (bf16 if requested ->
        # halves write-back bytes and vst vregs) instead of keeping it live across the
        # gate computation.
        y_ref[0] = yr.astype(y_ref.dtype)

        def _gate():
            # fc1 is pre-folded with the 1/(4*HW) pool normalization.
            h = jnp.maximum(
                jnp.dot(pooled[...], w1_ref[...],
                        preferred_element_type=jnp.float32), 0.0)
            return jax.nn.sigmoid(
                jnp.dot(h, w2_ref[...], preferred_element_type=jnp.float32))

        if fuse_gate:
            # Whole image in this tile: pool is complete -> gate and rescale in place,
            # avoiding a second HBM pass over the output.  (On v5e the read-back +
            # second store hits the single vst slot; bf16 out_dtype halves that cost.)
            g = _gate()
            gate_ref[0] = g.astype(gate_ref.dtype)
            y_ref[0] = (y_ref[0].astype(jnp.float32) * g).astype(y_ref.dtype)
        else:
            # gate_ref's index_map is constant over t, so its block stays resident in
            # VMEM across the whole 'arbitrary' axis and is flushed once per image n;
            # writing it only at the last t is therefore safe.  Do not change the gate
            # out index_map without revisiting this.
            @pl.when(t == pl.num_programs(1) - 1)
            def _():
                gate_ref[0] = _gate().astype(gate_ref.dtype)

    return kernel


def _rescale_kernel(y_ref, gate_ref, out_ref):
    """Pass 2 (only when HW is tiled): out = y_unscaled * gate, aliased in place."""
    out_ref[0] = (y_ref[0].astype(jnp.float32) * gate_ref[0]).astype(out_ref.dtype)


# ---------------------------------------------------------------------------
# Host-side VMEM budgeting / tiling / packing helpers
# ---------------------------------------------------------------------------
def _roundup(x, m):
    return ((x + m - 1) // m) * m


def _padded_bytes(rows, cols, nbytes):
    # (8, 128) layout padding, good-enough upper bound for budgeting.
    return _roundup(max(rows, 1), 8) * _roundup(max(cols, 1), 128) * nbytes


def _vmem_cap_bytes():
    """Generation-aware VMEM ceiling: ~75% of physical (≈48 MiB v7x, ≈96 MiB v5e/v6e)."""
    try:
        phys = int(pltpu.get_tpu_info().vmem_capacity_bytes)
    except Exception:
        phys = 64 << 20            # conservative (v7x-sized) default if the query fails
    return (phys * 3) // 4


def _pick_tile_hw(hw, cin, c4, x_bytes, y_bytes, cap, max_tile_hw, align):
    """Largest `align`-aligned divisor of HW whose double-buffered x/y tiles plus f32
    compute temps fit in ~55% of the per-generation VMEM cap (favours the fused-gate
    single-pass path)."""
    per_row = 2 * cin * x_bytes + 2 * c4 * y_bytes + 6 * c4 * 4   # dbl-buf x+y + f32 temps
    budget = int(0.55 * cap)
    limit = max(align, min(max_tile_hw, budget // max(per_row, 1)))
    if hw <= limit:
        return hw                                  # whole image per tile -> fused SE gate
    start = limit - (limit % align)
    for t in range(start, align - 1, -align):
        if hw % t == 0:
            return t
    if hw * per_row <= budget:                     # pathological HW (e.g. prime) but fits
        return hw
    raise ValueError(
        f"HW={hw} has no {align}-aligned divisor <= {limit} that fits the VMEM budget; "
        "pass tile_hw explicitly or pad HW.")


def _vmem_limit_bytes(tile, cin, c4, cred, x_bytes, y_bytes, w_bytes, cap, y_buffers):
    x_tile = _padded_bytes(tile, cin, x_bytes)
    y_tile = _padded_bytes(tile, c4, y_bytes)
    temps = 6 * tile * c4 * 4                        # f32 compute intermediates (y, y2, ...)
    params = (_padded_bytes(cin, c4, w_bytes)        # wcat
              + 3 * _padded_bytes(1, c4, 4)          # bias, ln gamma, ln beta
              + _padded_bytes(2 * c4, 8, 4)          # gmean2
              + _padded_bytes(8, 2 * c4, 4)          # gexp2
              + _padded_bytes(c4, cred, 4)           # SE fc1
              + _padded_bytes(cred, c4, 4))          # SE fc2
    scratch = 3 * _padded_bytes(1, c4, 4)            # pooled scratch + gate block buffers
    est = (2 * x_tile + max(2, y_buffers) * y_tile + temps + 2 * params + scratch
           + (4 << 20))                               # compiler slack
    return int(min(max(est, 24 << 20), cap))


def _pack_params(params, hw, use_bf16):
    wt = params["wt"]            # (Cin, Cout, 2, 2)  ConvTranspose2d weight
    b = params["b"]              # (Cout,)
    lnw, lnb = params["ln_w"], params["ln_b"]
    w1, w2 = params["se_w1"], params["se_w2"]   # (Cred, Cout), (Cout, Cred)
    cin, cout = wt.shape[0], wt.shape[1]
    c4 = 4 * cout

    # (Cin, Cout, di, dj) -> (p=2di+dj, Cin, Cout) -> (Cin, 4*Cout) with k = p*Cout + c.
    w4 = jnp.transpose(wt, (2, 3, 0, 1)).reshape(4, cin, cout)
    wcat = jnp.transpose(w4, (1, 0, 2)).reshape(cin, c4).astype(jnp.float32)
    if use_bf16:
        wcat = wcat.astype(jnp.bfloat16)

    bcat = jnp.tile(b.astype(jnp.float32), 4).reshape(1, c4)
    lnwcat = jnp.tile(lnw.astype(jnp.float32), 4).reshape(1, c4)
    lnbcat = jnp.tile(lnb.astype(jnp.float32), 4).reshape(1, c4)

    gmean = np.kron(np.eye(4, dtype=np.float32), np.ones((cout, 1), np.float32)) / cout
    gexp = np.kron(np.eye(4, dtype=np.float32), np.ones((1, cout), np.float32))
    gmean2 = jnp.asarray(np.kron(np.eye(2, dtype=np.float32), gmean))   # (2*c4, 8)
    gexp2 = jnp.asarray(np.kron(np.eye(2, dtype=np.float32), gexp))     # (8, 2*c4)

    # pooled_mean @ W1^T == pooled_sum_cat @ (tile(W1^T, 4x1) / (4*HW))
    w1cat = jnp.tile(jnp.transpose(w1).astype(jnp.float32), (4, 1)) / (4.0 * hw)
    # sigmoid(h @ W2^T) broadcast to all 4 sub-pixel groups == h @ tile(W2^T, 1x4).
    w2cat = jnp.tile(jnp.transpose(w2).astype(jnp.float32), (1, 4))
    return wcat, bcat, lnwcat, lnbcat, gmean2, gexp2, w1cat, w2cat


# ---------------------------------------------------------------------------
# Public entry points
# ---------------------------------------------------------------------------
def transpose_conv_with_se_flat(x_flat, params, *, tile_hw=None, max_tile_hw=16384,
                                use_bf16=None, out_dtype=None, y_buffers=2):
    """Channels-last core op.

    x_flat: (N, HW, Cin).  Returns (N, HW, 4*Cout) with last-dim index
    k = (2*di + dj) * Cout + c  (the 2x2 transpose-conv sub-pixel block).

    use_bf16   : bf16 x / conv weights on the MXU (f32 accumulation & LN/SE math).
                 Default True — native MXU throughput on v5e/v6e/v7x.
    out_dtype  : dtype of the stored output (and the two-pass intermediate).
                 Default float32 for PyTorch parity; bf16 halves write-back bytes.
    y_buffers  : pipelining depth of the output block (bump to 3 only if profiling
                 shows the write DMA exposed in the two-pass mode).
    """
    N, HW, Cin = x_flat.shape
    Cout = params["b"].shape[0]
    Cred = params["se_w1"].shape[0]
    c4 = 4 * Cout

    if use_bf16 is None:
        use_bf16 = True
    out_dtype = jnp.dtype(out_dtype) if out_dtype is not None else jnp.dtype(jnp.float32)

    x_bytes = 2 if use_bf16 else 4
    y_bytes = out_dtype.itemsize
    align = 16 if (x_bytes == 2 or y_bytes == 2) else 8   # bf16 packs 16 rows/vreg

    cap = _vmem_cap_bytes()
    tile = tile_hw if tile_hw is not None else _pick_tile_hw(
        HW, Cin, c4, x_bytes, y_bytes, cap, max_tile_hw, align)
    if HW % tile != 0:
        raise ValueError(f"tile_hw={tile} must divide HW={HW}")
    if tile != HW and tile % 8 != 0:
        raise ValueError(f"tile_hw={tile} must be a multiple of 8 when smaller than HW")
    T = HW // tile
    fuse_gate = (T == 1)

    packed = _pack_params(params, HW, use_bf16)
    x = x_flat.astype(jnp.bfloat16 if use_bf16 else jnp.float32)
    vmem_limit = _vmem_limit_bytes(tile, Cin, c4, Cred, x_bytes, y_bytes, x_bytes, cap,
                                   y_buffers)

    fixed = lambda n, t: (0, 0)
    y_map = lambda n, t: (n, t, 0)
    if y_buffers > 2:
        y_spec = pl.BlockSpec((1, tile, c4), y_map, pipeline_mode=pl.Buffered(y_buffers))
    else:
        y_spec = pl.BlockSpec((1, tile, c4), y_map)

    # NOTE (v7x, small N): both TensorCores can only be used by adding a leading
    # parallel HW-split axis with per-half partial pools + an always-on rescale pass.
    y_unscaled, gate = pl.pallas_call(
        _make_compute_kernel(fuse_gate, c4),
        out_shape=(jax.ShapeDtypeStruct((N, HW, c4), out_dtype),
                   jax.ShapeDtypeStruct((N, 1, c4), jnp.float32)),
        grid_spec=pltpu.PrefetchScalarGridSpec(
            num_scalar_prefetch=0,
            grid=(N, T),
            in_specs=[
                pl.BlockSpec((1, tile, Cin), lambda n, t: (n, t, 0)),   # x
                pl.BlockSpec((Cin, c4), fixed),                         # wcat
                pl.BlockSpec((1, c4), fixed),                           # bias
                pl.BlockSpec((1, c4), fixed),                           # ln gamma
                pl.BlockSpec((1, c4), fixed),                           # ln beta
                pl.BlockSpec((2 * c4, 8), fixed),                       # gmean2
                pl.BlockSpec((8, 2 * c4), fixed),                       # gexp2
                pl.BlockSpec((c4, Cred), fixed),                        # SE fc1
                pl.BlockSpec((Cred, c4), fixed),                        # SE fc2
            ],
            out_specs=[
                y_spec,                                                 # y (lane-dense)
                pl.BlockSpec((1, 1, c4), lambda n, t: (n, 0, 0)),       # gate
            ],
            scratch_shapes=[pltpu.VMEM((1, c4), jnp.float32)],          # pooled sum
        ),
        compiler_params=pltpu.CompilerParams(
            dimension_semantics=("parallel", "arbitrary"),
            vmem_limit_bytes=vmem_limit),
    )(x, *packed)

    if fuse_gate:
        return y_unscaled  # gate already applied in-kernel (single HBM pass)

    # Second (tiny, bandwidth-only) pass: apply the SE gate, aliased in place.
    return pl.pallas_call(
        _rescale_kernel,
        out_shape=jax.ShapeDtypeStruct((N, HW, c4), out_dtype),
        grid_spec=pltpu.PrefetchScalarGridSpec(
            num_scalar_prefetch=0,
            grid=(N, T),
            in_specs=[
                pl.BlockSpec((1, tile, c4), lambda n, t: (n, t, 0)),
                pl.BlockSpec((1, 1, c4), lambda n, t: (n, 0, 0)),
            ],
            out_specs=pl.BlockSpec((1, tile, c4), lambda n, t: (n, t, 0)),
        ),
        compiler_params=pltpu.CompilerParams(
            dimension_semantics=("parallel", "parallel"),
            vmem_limit_bytes=vmem_limit),
        input_output_aliases={0: 0},
    )(y_unscaled, gate)


def transpose_conv_with_se(x_nchw, params, **kw):
    """PyTorch-parity wrapper: NCHW in -> NCHW out.

    The NCHW <-> channels-last permutes are XLA glue kept only for parity testing;
    in a real pipeline keep (N, HW, C) end-to-end and call transpose_conv_with_se_flat
    directly (saves 2-3 full HBM traversals of this bandwidth-bound op).
    """
    N, Cin, H, W = x_nchw.shape
    Cout = params["b"].shape[0]
    x_flat = jnp.transpose(x_nchw, (0, 2, 3, 1)).reshape(N, H * W, Cin)
    y = transpose_conv_with_se_flat(x_flat, params, **kw)       # (N, HW, 4*Cout)
    y = y.reshape(N, H, W, 2, 2, Cout)                          # (n, i, j, di, dj, c)
    y = jnp.transpose(y, (0, 5, 1, 3, 2, 4))                    # (n, c, i, di, j, dj)
    return y.reshape(N, Cout, 2 * H, 2 * W)


# ---------------------------------------------------------------------------
# Pure-numpy reference (float64) replicating the PyTorch forward
# ---------------------------------------------------------------------------
def reference_numpy(x_nchw, params):
    x = np.asarray(x_nchw, np.float64)
    wt = np.asarray(params["wt"], np.float64)
    b = np.asarray(params["b"], np.float64)
    lnw = np.asarray(params["ln_w"], np.float64)
    lnb = np.asarray(params["ln_b"], np.float64)
    w1 = np.asarray(params["se_w1"], np.float64)
    w2 = np.asarray(params["se_w2"], np.float64)
    N, Cin, H, W = x.shape
    Cout = b.shape[0]
    y = np.zeros((N, Cout, 2 * H, 2 * W))
    for di in range(2):
        for dj in range(2):
            y[:, :, di::2, dj::2] = np.einsum("nihw,io->nohw", x, wt[:, :, di, dj])
    y += b[None, :, None, None]
    u = y.mean(1, keepdims=True)
    s = ((y - u) ** 2).mean(1, keepdims=True)
    y = (y - u) / np.sqrt(s + EPS)
    y = lnw[None, :, None, None] * y + lnb[None, :, None, None]
    y = np.maximum(y, 0.0)
    pooled = y.mean(axis=(2, 3))
    h = np.maximum(pooled @ w1.T, 0.0)
    gate = 1.0 / (1.0 + np.exp(-(h @ w2.T)))
    return y * gate[:, :, None, None]


if __name__ == "__main__":
    N, Cin, Cout, H, W = 2, 16, 32, 16, 16   # 4*Cout = 128 -> lane-dense output blocks
    Cred = Cout // 4                          # SE reduction=4

    ks = jax.random.split(jax.random.PRNGKey(0), 7)
    x = jax.random.normal(ks[0], (N, Cin, H, W), jnp.float32)
    params = {
        "wt": 0.3 * jax.random.normal(ks[1], (Cin, Cout, 2, 2), jnp.float32),
        "b": 0.1 * jax.random.normal(ks[2], (Cout,), jnp.float32),
        "ln_w": 1.0 + 0.1 * jax.random.normal(ks[3], (Cout,), jnp.float32),
        "ln_b": 0.1 * jax.random.normal(ks[4], (Cout,), jnp.float32),
        "se_w1": 0.5 * jax.random.normal(ks[5], (Cred, Cout), jnp.float32),
        "se_w2": 0.5 * jax.random.normal(ks[6], (Cout, Cred), jnp.float32),
    }
    ref = reference_numpy(x, params)

    def to_np(a):
        return np.asarray(a.astype(jnp.float32))

    # 1) full-precision fused single-pass path (tile = HW, SE gate applied in-kernel).
    out = jax.block_until_ready(transpose_conv_with_se(x, params, use_bf16=False))
    assert out.shape == (N, Cout, 2 * H, 2 * W), out.shape
    np.testing.assert_allclose(to_np(out), ref, rtol=2e-4, atol=2e-4)

    # 2) full-precision tiled two-pass path (partial pool + aliased rescale pass).
    out_tiled = jax.block_until_ready(
        transpose_conv_with_se(x, params, use_bf16=False, tile_hw=64))
    np.testing.assert_allclose(to_np(out_tiled), ref, rtol=2e-4, atol=2e-4)

    # 3) defaults: bf16 matmul operands (native MXU rate), f32 output, fused path.
    out_def = jax.block_until_ready(transpose_conv_with_se(x, params))
    np.testing.assert_allclose(to_np(out_def), ref, rtol=5e-2, atol=5e-2)

    # 4) bandwidth-lean config: bf16 inputs AND bf16 output, tiled two-pass path.
    out_bf16 = jax.block_until_ready(
        transpose_conv_with_se(x, params, use_bf16=True, out_dtype=jnp.bfloat16,
                               tile_hw=64))
    np.testing.assert_allclose(to_np(out_bf16), ref, rtol=6e-2, atol=6e-2)

    print("KERNEL_OK")
</pallas_src>

<mosaic_0001>
module attributes {stable_mosaic.version = 11 : i64} {
  func.func @kernel(%arg0: i32, %arg1: i32, %arg2: memref<1x256x16xf32, #tpu.memory_space<vmem>>, %arg3: memref<16x128xf32, #tpu.memory_space<vmem>>, %arg4: memref<1x128xf32, #tpu.memory_space<vmem>>, %arg5: memref<1x128xf32, #tpu.memory_space<vmem>>, %arg6: memref<1x128xf32, #tpu.memory_space<vmem>>, %arg7: memref<256x8xf32, #tpu.memory_space<vmem>>, %arg8: memref<8x256xf32, #tpu.memory_space<vmem>>, %arg9: memref<128x8xf32, #tpu.memory_space<vmem>>, %arg10: memref<8x128xf32, #tpu.memory_space<vmem>>, %arg11: memref<1x256x128xf32, #tpu.memory_space<vmem>>, %arg12: memref<1x1x128xf32, #tpu.memory_space<vmem>>, %arg13: memref<1x128xf32, #tpu.memory_space<vmem>>) attributes {dimension_semantics = [#tpu.dimension_semantics<parallel>, #tpu.dimension_semantics<arbitrary>], iteration_bounds = array<i64: 2, 1>, scalar_prefetch = 0 : i64, scratch_operands = 1 : i64, tpu.core_type = #tpu.core_type<tc>, window_params = [{transform_indices = @transform_0, window_bounds = array<i64: 1, 256, 16>}, {pipeline_mode = #tpu.pipeline_mode<synchronous>, transform_indices = @transform_1, window_bounds = array<i64: 16, 128>}, {pipeline_mode = #tpu.pipeline_mode<synchronous>, transform_indices = @transform_2, window_bounds = array<i64: 1, 128>}, {pipeline_mode = #tpu.pipeline_mode<synchronous>, transform_indices = @transform_3, window_bounds = array<i64: 1, 128>}, {pipeline_mode = #tpu.pipeline_mode<synchronous>, transform_indices = @transform_4, window_bounds = array<i64: 1, 128>}, {pipeline_mode = #tpu.pipeline_mode<synchronous>, transform_indices = @transform_5, window_bounds = array<i64: 256, 8>}, {pipeline_mode = #tpu.pipeline_mode<synchronous>, transform_indices = @transform_6, window_bounds = array<i64: 8, 256>}, {pipeline_mode = #tpu.pipeline_mode<synchronous>, transform_indices = @transform_7, window_bounds = array<i64: 128, 8>}, {pipeline_mode = #tpu.pipeline_mode<synchronous>, transform_indices = @transform_8, window_bounds = array<i64: 8, 128>}, {transform_indices = @transform_9, window_bounds = array<i64: 1, 256, 128>}, {transform_indices = @transform_10, window_bounds = array<i64: 1, 1, 128>}]} {
    %c0_i32 = arith.constant 0 : i32
    %0 = arith.cmpi eq, %arg1, %c0_i32 : i32
    %1 = arith.extui %0 : i1 to i32
    %c0_i32_0 = arith.constant 0 : i32
    %2 = arith.cmpi ne, %1, %c0_i32_0 : i32
    scf.if %2 {
      %cst_47 = arith.constant 0.000000e+00 : f32
      %65 = vector.broadcast %cst_47 : f32 to vector<1x128xf32>
      %c0_48 = arith.constant 0 : index
      %c0_49 = arith.constant 0 : index
      %66 = vector.load %arg13[%c0_48, %c0_49] : memref<1x128xf32, #tpu.memory_space<vmem>>, vector<1x128xf32>
      tpu.vector_store %arg13[%c0_48, %c0_49], %65 {strides = array<i32>} : memref<1x128xf32, #tpu.memory_space<vmem>>, vector<1x128xf32>,
    } else {
    }
    %c0 = arith.constant 0 : index
    %c0_1 = arith.constant 0 : index
    %c0_2 = arith.constant 0 : index
    %3 = vector.load %arg2[%c0, %c0_1, %c0_2] : memref<1x256x16xf32, #tpu.memory_space<vmem>>, vector<1x256x16xf32>
    %4 = vector.shape_cast %3 : vector<1x256x16xf32> to vector<256x16xf32>
    %c0_3 = arith.constant 0 : index
    %c0_4 = arith.constant 0 : index
    %5 = vector.load %arg3[%c0_3, %c0_4] : memref<16x128xf32, #tpu.memory_space<vmem>>, vector<16x128xf32>
    %cst = arith.constant dense<0.000000e+00> : vector<256x128xf32>
    %6 = tpu.matmul %4, %5, %cst {dimension_numbers = #tpu.dot_dimension_numbers<[1], [0], [0], [1], [0, 0, 1, 1], [], []>} : vector<256x16xf32>, vector<16x128xf32>, vector<256x128xf32> -> vector<256x128xf32>
    %c0_5 = arith.constant 0 : index
    %c0_6 = arith.constant 0 : index
    %7 = vector.load %arg4[%c0_5, %c0_6] : memref<1x128xf32, #tpu.memory_space<vmem>>, vector<1x128xf32>
    %8 = vector.broadcast %7 : vector<1x128xf32> to vector<256x128xf32>
    %9 = arith.addf %6, %8 : vector<256x128xf32>
    %10 = arith.mulf %9, %9 : vector<256x128xf32>
    %11 = tpu.concatenate %9, %10 in 1 : vector<256x128xf32>, vector<256x128xf32> -> vector<256x256xf32>
    %c0_7 = arith.constant 0 : index
    %c0_8 = arith.constant 0 : index
    %12 = vector.load %arg7[%c0_7, %c0_8] : memref<256x8xf32, #tpu.memory_space<vmem>>, vector<256x8xf32>
    %cst_9 = arith.constant dense<0.000000e+00> : vector<256x8xf32>
    %13 = tpu.matmul %11, %12, %cst_9 {dimension_numbers = #tpu.dot_dimension_numbers<[1], [0], [0], [1], [0, 0, 1, 1], [], []>} : vector<256x256xf32>, vector<256x8xf32>, vector<256x8xf32> -> vector<256x8xf32>
    %c0_10 = arith.constant 0 : index
    %c0_11 = arith.constant 0 : index
    %14 = vector.load %arg8[%c0_10, %c0_11] : memref<8x256xf32, #tpu.memory_space<vmem>>, vector<8x256xf32>
    %cst_12 = arith.constant dense<0.000000e+00> : vector<256x256xf32>
    %15 = tpu.matmul %13, %14, %cst_12 {dimension_numbers = #tpu.dot_dimension_numbers<[1], [0], [0], [1], [0, 0, 1, 1], [], []>} : vector<256x8xf32>, vector<8x256xf32>, vector<256x256xf32> -> vector<256x256xf32>
    %16 = vector.extract_strided_slice %15 {offsets = [0, 0], sizes = [256, 128], strides = [1, 1]} : vector<256x256xf32> to vector<256x128xf32>
    %17 = vector.extract_strided_slice %15 {offsets = [0, 128], sizes = [256, 128], strides = [1, 1]} : vector<256x256xf32> to vector<256x128xf32>
    %18 = arith.mulf %16, %16 : vector<256x128xf32>
    %19 = arith.subf %17, %18 : vector<256x128xf32>
    %cst_13 = arith.constant 0.000000e+00 : f32
    %20 = vector.broadcast %cst_13 : f32 to vector<256x128xf32>
    %21 = arith.maximumf %19, %20 : vector<256x128xf32>
    %cst_14 = arith.constant 9.99999997E-7 : f32
    %22 = vector.broadcast %cst_14 : f32 to vector<256x128xf32>
    %23 = arith.addf %21, %22 : vector<256x128xf32>
    %24 = math.rsqrt %23 : vector<256x128xf32>
    %25 = arith.subf %9, %16 : vector<256x128xf32>
    %26 = arith.mulf %25, %24 : vector<256x128xf32>
    %c0_15 = arith.constant 0 : index
    %c0_16 = arith.constant 0 : index
    %27 = vector.load %arg5[%c0_15, %c0_16] : memref<1x128xf32, #tpu.memory_space<vmem>>, vector<1x128xf32>
    %28 = vector.broadcast %27 : vector<1x128xf32> to vector<256x128xf32>
    %29 = arith.mulf %26, %28 : vector<256x128xf32>
    %c0_17 = arith.constant 0 : index
    %c0_18 = arith.constant 0 : index
    %30 = vector.load %arg6[%c0_17, %c0_18] : memref<1x128xf32, #tpu.memory_space<vmem>>, vector<1x128xf32>
    %31 = vector.broadcast %30 : vector<1x128xf32> to vector<256x128xf32>
    %32 = arith.addf %29, %31 : vector<256x128xf32>
    %cst_19 = arith.constant 0.000000e+00 : f32
    %33 = vector.broadcast %cst_19 : f32 to vector<256x128xf32>
    %34 = arith.maximumf %32, %33 : vector<256x128xf32>
    %c0_20 = arith.constant 0 : index
    %c0_21 = arith.constant 0 : index
    %35 = vector.load %arg13[%c0_20, %c0_21] : memref<1x128xf32, #tpu.memory_space<vmem>>, vector<1x128xf32>
    %cst_22 = arith.constant dense<0.000000e+00> : vector<128xf32>
    %36 = vector.multi_reduction <add>, %34, %cst_22 [0] : vector<256x128xf32> to vector<128xf32>
    %37 = vector.shape_cast %36 : vector<128xf32> to vector<1x128xf32>
    %38 = arith.addf %35, %37 : vector<1x128xf32>
    %c0_23 = arith.constant 0 : index
    %c0_24 = arith.constant 0 : index
    %39 = vector.load %arg13[%c0_23, %c0_24] : memref<1x128xf32, #tpu.memory_space<vmem>>, vector<1x128xf32>
    tpu.vector_store %arg13[%c0_23, %c0_24], %38 {strides = array<i32>} : memref<1x128xf32, #tpu.memory_space<vmem>>, vector<1x128xf32>,
    %c0_25 = arith.constant 0 : index
    %c0_26 = arith.constant 0 : index
    %c0_27 = arith.constant 0 : index
    %40 = vector.load %arg11[%c0_25, %c0_26, %c0_27] : memref<1x256x128xf32, #tpu.memory_space<vmem>>, vector<1x256x128xf32>
    %41 = vector.shape_cast %40 : vector<1x256x128xf32> to vector<256x128xf32>
    %42 = vector.shape_cast %34 : vector<256x128xf32> to vector<1x256x128xf32>
    tpu.vector_store %arg11[%c0_25, %c0_26, %c0_27], %42 {strides = array<i32>} : memref<1x256x128xf32, #tpu.memory_space<vmem>>, vector<1x256x128xf32>,
    %c0_28 = arith.constant 0 : index
    %c0_29 = arith.constant 0 : index
    %43 = vector.load %arg13[%c0_28, %c0_29] : memref<1x128xf32, #tpu.memory_space<vmem>>, vector<1x128xf32>
    %c0_30 = arith.constant 0 : index
    %c0_31 = arith.constant 0 : index
    %44 = vector.load %arg9[%c0_30, %c0_31] : memref<128x8xf32, #tpu.memory_space<vmem>>, vector<128x8xf32>
    %cst_32 = arith.constant dense<0.000000e+00> : vector<1x8xf32>
    %45 = tpu.matmul %43, %44, %cst_32 {dimension_numbers = #tpu.dot_dimension_numbers<[1], [0], [0], [1], [0, 0, 1, 1], [], []>} : vector<1x128xf32>, vector<128x8xf32>, vector<1x8xf32> -> vector<1x8xf32>
    %cst_33 = arith.constant 0.000000e+00 : f32
    %46 = vector.broadcast %cst_33 : f32 to vector<1x8xf32>
    %47 = arith.maximumf %45, %46 : vector<1x8xf32>
    %c0_34 = arith.constant 0 : index
    %c0_35 = arith.constant 0 : index
    %48 = vector.load %arg10[%c0_34, %c0_35] : memref<8x128xf32, #tpu.memory_space<vmem>>, vector<8x128xf32>
    %cst_36 = arith.constant dense<0.000000e+00> : vector<1x128xf32>
    %49 = tpu.matmul %47, %48, %cst_36 {dimension_numbers = #tpu.dot_dimension_numbers<[1], [0], [0], [1], [0, 0, 1, 1], [], []>} : vector<1x8xf32>, vector<8x128xf32>, vector<1x128xf32> -> vector<1x128xf32>
    %50 = arith.negf %49 : vector<1x128xf32>
    %51 = math.exp %50 : vector<1x128xf32>
    %cst_37 = arith.constant 1.000000e+00 : f32
    %52 = vector.broadcast %cst_37 : f32 to vector<1x128xf32>
    %53 = arith.addf %52, %51 : vector<1x128xf32>
    %54 = arith.divf %52, %53 : vector<1x128xf32>
    %c0_38 = arith.constant 0 : index
    %c0_39 = arith.constant 0 : index
    %c0_40 = arith.constant 0 : index
    %55 = vector.load %arg12[%c0_38, %c0_39, %c0_40] : memref<1x1x128xf32, #tpu.memory_space<vmem>>, vector<1x1x128xf32>
    %56 = vector.shape_cast %55 : vector<1x1x128xf32> to vector<1x128xf32>
    %57 = vector.shape_cast %54 : vector<1x128xf32> to vector<1x1x128xf32>
    tpu.vector_store %arg12[%c0_38, %c0_39, %c0_40], %57 {strides = array<i32>} : memref<1x1x128xf32, #tpu.memory_space<vmem>>, vector<1x1x128xf32>,
    %c0_41 = arith.constant 0 : index
    %c0_42 = arith.constant 0 : index
    %c0_43 = arith.constant 0 : index
    %58 = vector.load %arg11[%c0_41, %c0_42, %c0_43] : memref<1x256x128xf32, #tpu.memory_space<vmem>>, vector<1x256x128xf32>
    %59 = vector.shape_cast %58 : vector<1x256x128xf32> to vector<256x128xf32>
    %60 = vector.broadcast %54 : vector<1x128xf32> to vector<256x128xf32>
    %61 = arith.mulf %59, %60 : vector<256x128xf32>
    %c0_44 = arith.constant 0 : index
    %c0_45 = arith.constant 0 : index
    %c0_46 = arith.constant 0 : index
    %62 = vector.load %arg11[%c0_44, %c0_45, %c0_46] : memref<1x256x128xf32, #tpu.memory_space<vmem>>, vector<1x256x128xf32>
    %63 = vector.shape_cast %62 : vector<1x256x128xf32> to vector<256x128xf32>
    %64 = vector.shape_cast %61 : vector<256x128xf32> to vector<1x256x128xf32>
    tpu.vector_store %arg11[%c0_44, %c0_45, %c0_46], %64 {strides = array<i32>} : memref<1x256x128xf32, #tpu.memory_space<vmem>>, vector<1x256x128xf32>,
    return
  }
  func.func @transform_0(%arg0: i32, %arg1: i32) -> (i32, i32, i32) {
    %c0_i32 = arith.constant 0 : i32
    %c0_i32_0 = arith.constant 0 : i32
    return %arg0, %arg1, %c0_i32 : i32, i32, i32
  }
  func.func @transform_1(%arg0: i32, %arg1: i32) -> (i32, i32) {
    %c0_i32 = arith.constant 0 : i32
    %c0_i32_0 = arith.constant 0 : i32
    %c0_i32_1 = arith.constant 0 : i32
    return %c0_i32, %c0_i32_0 : i32, i32
  }
  func.func @transform_2(%arg0: i32, %arg1: i32) -> (i32, i32) {
    %c0_i32 = arith.constant 0 : i32
    %c0_i32_0 = arith.constant 0 : i32
    %c0_i32_1 = arith.constant 0 : i32
    return %c0_i32, %c0_i32_0 : i32, i32
  }
  func.func @transform_3(%arg0: i32, %arg1: i32) -> (i32, i32) {
    %c0_i32 = arith.constant 0 : i32
    %c0_i32_0 = arith.constant 0 : i32
    %c0_i32_1 = arith.constant 0 : i32
    return %c0_i32, %c0_i32_0 : i32, i32
  }
  func.func @transform_4(%arg0: i32, %arg1: i32) -> (i32, i32) {
    %c0_i32 = arith.constant 0 : i32
    %c0_i32_0 = arith.constant 0 : i32
    %c0_i32_1 = arith.constant 0 : i32
    return %c0_i32, %c0_i32_0 : i32, i32
  }
  func.func @transform_5(%arg0: i32, %arg1: i32) -> (i32, i32) {
    %c0_i32 = arith.constant 0 : i32
    %c0_i32_0 = arith.constant 0 : i32
    %c0_i32_1 = arith.constant 0 : i32
    return %c0_i32, %c0_i32_0 : i32, i32
  }
  func.func @transform_6(%arg0: i32, %arg1: i32) -> (i32, i32) {
    %c0_i32 = arith.constant 0 : i32
    %c0_i32_0 = arith.constant 0 : i32
    %c0_i32_1 = arith.constant 0 : i32
    return %c0_i32, %c0_i32_0 : i32, i32
  }
  func.func @transform_7(%arg0: i32, %arg1: i32) -> (i32, i32) {
    %c0_i32 = arith.constant 0 : i32
    %c0_i32_0 = arith.constant 0 : i32
    %c0_i32_1 = arith.constant 0 : i32
    return %c0_i32, %c0_i32_0 : i32, i32
  }
  func.func @transform_8(%arg0: i32, %arg1: i32) -> (i32, i32) {
    %c0_i32 = arith.constant 0 : i32
    %c0_i32_0 = arith.constant 0 : i32
    %c0_i32_1 = arith.constant 0 : i32
    return %c0_i32, %c0_i32_0 : i32, i32
  }
  func.func @transform_9(%arg0: i32, %arg1: i32) -> (i32, i32, i32) {
    %c0_i32 = arith.constant 0 : i32
    %c0_i32_0 = arith.constant 0 : i32
    return %arg0, %arg1, %c0_i32 : i32, i32, i32
  }
  func.func @transform_10(%arg0: i32, %arg1: i32) -> (i32, i32, i32) {
    %c0_i32 = arith.constant 0 : i32
    %c0_i32_0 = arith.constant 0 : i32
    %c0_i32_1 = arith.constant 0 : i32
    return %arg0, %c0_i32, %c0_i32_0 : i32, i32, i32
  }
}

</mosaic_0001>

<bundles_post_ra>
// kernel: tpu_custom_call.1
= control target key start
LH: loop header
LB: loop body
LE: loop exit
PB: predicated region body
PF: predicated region fallthrough
CT: control target
= control target key end

     0   :  { %s4066_s0 = inlined_call_operand.vmem [shape: f32[2,256,16], index: 0, kind: input, shape index: {}]   ;;  %s4067_s1 = inlined_call_operand.vmem [shape: f32[16,128], index: 1, kind: input, shape index: {}]   ;;  %s4068_s2 = inlined_call_operand.vmem [shape: f32[1,128], index: 2, kind: input, shape index: {}]   ;;  %s4069_s3 = inlined_call_operand.vmem [shape: f32[1,128], index: 3, kind: input, shape index: {}]   ;;  %s4070_s4 = inlined_call_operand.vmem [shape: f32[1,128], index: 4, kind: input, shape index: {}]   ;;  %s4071_s5 = inlined_call_operand.vmem [shape: f32[256,8], index: 5, kind: input, shape index: {}]   ;;  %s4072_s6 = inlined_call_operand.vmem [shape: f32[8,256], index: 6, kind: input, shape index: {}]   ;;  %s4073_s7 = inlined_call_operand.vmem [shape: f32[128,8], index: 7, kind: input, shape index: {}]   ;;  %s4074_s8 = inlined_call_operand.vmem [shape: f32[8,128], index: 8, kind: input, shape index: {}]   ;;  %s4075_s9 = inlined_call_operand.hbm [shape: f32[2,256,128], index: 9, kind: output, shape index: {0}]   ;;  %s4076_s10 = inlined_call_operand.hbm [shape: f32[2,1,128], index: 10, kind: output, shape index: {1}]  }
   0x1   :  { %4093 = sst [smem:[#allocation9_spill]] %s4066_s0 }
   0x2   :  { %4094 = sst [smem:[#allocation10_spill]] %s4067_s1 }
   0x3   :  { %16 = vsyncpa [#allocation4], 0 }
   0x4   :  { %18 = vsyncpa [#allocation4 + $0x1], 0 }
   0x5   :  { %19 = vsyncpa [#allocation6], 0 }
   0x6   :  { %21 = vsyncpa [#allocation6 + $0x1], 0  ;;  %s2840_s13 = smov 0   ;;  %s2842_s14 = smov 0  }
   0x7   :  { %s2844_s15 = smov 0   ;;  %s2846_s16 = smov 0  }
   0x8   :  { %s2848_s17 = smov 0   ;;  %s2850_s18 = smov 0  }
   0x9 LB: > { %s2227_s19 = sadd.s32 4294967295, %s2776_s18   ;;  %s2228_s20 = sadd.s32 4294967294, %s2776_s18   ;;  %s2776_s18 = sphi %s2850_s18, %s27_s18   ;;  %s2772_s17 = sphi %s2848_s17, %s4120_s17   ;;  %s2768_s16 = sphi %s2846_s16, %s4119_s16   ;;  %s2764_s15 = sphi %s2844_s15, %s4118_s15   ;;  %s2760_s14 = sphi %s2842_s14, %s4117_s14   ;;  %s2756_s13 = sphi %s2840_s13, %s4116_s13  }
   0xa   : > { %s39_s21 = sadd.s32 1, %s2772_s17  ;;  %s244_s22 = sadd.s32 1, %s2764_s15 }
   0xb   : > { %p41_p0 = scmp.ge.s32.totalorder %s39_s21, 2  ;;  %p254_p1 = scmp.ne.s32.totalorder %s2764_s15, %s2760_s14 }
   0xc   : > { %p255_p2 = scmp.eq.s32.totalorder %s2227_s19, 1  ;;  %p260_p3 = scmp.ne.s32.totalorder %s2760_s14, %s2756_s13 }
   0xd   : > { %s4122_s21 = smov (%p41_p0, %s39_s21), 0  ;;  %p261_p5 = scmp.eq.s32.totalorder %s2228_s20, 1 }
   0xe   : > { %p2880_p4 = por %p255_p2, %p254_p1  ;;  %s239_s24 = ssub.s32 %s2772_s17, %s4122_s21 }
   0xf   : > { %p2231_p6 = scmp.ge.s32.totalorder %s2776_s18, 1  ;;  %p242_p7 = scmp.eq.s32.totalorder %s239_s24, 0 }
  0x10   : > { %p2887_p8 = por %p261_p5, %p260_p3  ;;  %p342_p9 = scmp.lt.s32.totalorder %s2776_s18, 3 }
  0x11   : > { %s2893_s26 = scalar_select %p242_p7, %s2764_s15, %s244_s22  }
  0x12   : > { %p343_p10 = pnand %p2231_p6, %p342_p9 }
  0x13   : > { %s4097_s1 = sld [smem:[#allocation10_spill]] (!%p343_p10)  ;;  %p389_p11 = scmp.lt.s32.totalorder (!%p343_p10), %s2768_s16, 1  ;;  %v799_v2 = vld [vmem:[%s4071_s5] sm:$0xff] (!%p343_p10)  ;;  %v2778_v4 = vmov (!%p343_p10), 0.0|0.0   ;;  %v800_v5 = vld [vmem:[%s4071_s5 + $0x8] sm:$0xff] (!%p343_p10)  ;;  %v801_v6 = vld [vmem:[%s4071_s5 + $0x10] sm:$0xff] (!%p343_p10) }
  0x14   : > { %346 = sbr.rel (%p343_p10) target bundleno = 1349 (0x545), region = 56  ;;  %2461 = vmatprep.subr.bf16.mxu1 (!%p343_p10), %v2778_v4  ;;  %v802_v7 = vld [vmem:[%s4071_s5 + $0x18] sm:$0xff] (!%p343_p10)  ;;  %v2462_v8 = vpack.c.bf16 (!%p343_p10), %v800_v5, %v799_v2  ;;  %vm445_vm0 = vcmask (!%p343_p10), 130048   ;;  %s4098_s0 = sld [smem:[#allocation9_spill]] (!%p343_p10)  ;;  %v803_v10 = vld [vmem:[%s4071_s5 + $0x20] sm:$0xff] (!%p343_p10)  ;;  %v804_v11 = vld [vmem:[%s4071_s5 + $0x28] sm:$0xff] (!%p343_p10) }
  0x15   : > { %v2465_v9 = vpack.c.bf16 (!%p343_p10), %v802_v7, %v801_v6  ;;  %v2468_v15 = vpack.c.bf16 (!%p343_p10), %v804_v11, %v803_v10  ;;  %v805_v17 = vld [vmem:[%s4071_s5 + $0x30] sm:$0xff] (!%p343_p10)  ;;  %v806_v18 = vld [vmem:[%s4071_s5 + $0x38] sm:$0xff] (!%p343_p10)  ;;  %v807_v22 = vld [vmem:[%s4071_s5 + $0x40] sm:$0xff] (!%p343_p10)  ;;  %vm1058_vm1 = vcmask (!%p343_p10), 64512   ;;  %vm2780_vm2 = vmmov (!%p343_p10), 0   ;;  %s2781_s20 = smov (!%p343_p10), [#allocation5]  }
  0x16   : > { %2463 = vmatpush1.bf16.msra.mxu1 (!%p343_p10), %v2462_v8  ;;  %v2471_v20 = vpack.c.bf16 (!%p343_p10), %v806_v18, %v805_v17  ;;  %v808_v23 = vld [vmem:[%s4071_s5 + $0x48] sm:$0xff] (!%p343_p10)  ;;  %v809_v27 = vld [vmem:[%s4071_s5 + $0x50] sm:$0xff] (!%p343_p10)  ;;  %v810_v28 = vld [vmem:[%s4071_s5 + $0x58] sm:$0xff] (!%p343_p10) }
  0x17   : > { %2464 = vmatprep.subr.bf16.mxu1 (!%p343_p10), %v2778_v4  ;;  %v2474_v25 = vpack.c.bf16 (!%p343_p10), %v808_v23, %v807_v22  ;;  %v2477_v30 = vpack.c.bf16 (!%p343_p10), %v810_v28, %v809_v27  ;;  %v811_v32 = vld [vmem:[%s4071_s5 + $0x60] sm:$0xff] (!%p343_p10)  ;;  %v812_v33 = vld [vmem:[%s4071_s5 + $0x68] sm:$0xff] (!%p343_p10)  ;;  %v813_v37 = vld [vmem:[%s4071_s5 + $0x70] sm:$0xff] (!%p343_p10) }
  0x18   : > { %v2480_v35 = vpack.c.bf16 (!%p343_p10), %v812_v33, %v811_v32  ;;  %v814_v38 = vld [vmem:[%s4071_s5 + $0x78] sm:$0xff] (!%p343_p10)  ;;  %v815_v42 = vld [vmem:[%s4071_s5 + $0x80] sm:$0xff] (!%p343_p10)  ;;  %v816_v43 = vld [vmem:[%s4071_s5 + $0x88] sm:$0xff] (!%p343_p10) }
  0x19   : > { %v436_v0 = vld [vmem:[%s4097_s1] sm:$0xff] (!%p343_p10)  ;;  %v437_v1 = vld [vmem:[%s4097_s1 + $0x8] sm:$0xff] (!%p343_p10)  ;;  %v2483_v40 = vpack.c.bf16 (!%p343_p10), %v814_v38, %v813_v37  ;;  %v2486_v45 = vpack.c.bf16 (!%p343_p10), %v816_v43, %v815_v42  ;;  %v817_v47 = vld [vmem:[%s4071_s5 + $0x90] sm:$0xff] (!%p343_p10) }
  0x1a   : > { %v2457_v3 = vpack.c.bf16 (!%p343_p10), %v437_v1, %v436_v0  ;;  %2466 = vmatpush1.bf16.msra.mxu1 (!%p343_p10), %v2465_v9  ;;  %v818_v48 = vld [vmem:[%s4071_s5 + $0x98] sm:$0xff] (!%p343_p10)  ;;  %v819_v52 = vld [vmem:[%s4071_s5 + $0xa0] sm:$0xff] (!%p343_p10)  ;;  %v820_v53 = vld [vmem:[%s4071_s5 + $0xa8] sm:$0xff] (!%p343_p10) }
  0x1b   : > { %s390_s29 = scalar_select %p389_p11, %s2768_s16, 1  ;;  %2467 = vmatprep.subr.bf16.mxu1 %v2778_v4  ;;  %v2489_v50 = vpack.c.bf16 %v818_v48, %v817_v47  ;;  %v2492_v55 = vpack.c.bf16 %v820_v53, %v819_v52  ;;  %v821_v57 = vld [vmem:[%s4071_s5 + $0xb0] sm:$0xff]  ;;  %v822_v58 = vld [vmem:[%s4071_s5 + $0xb8] sm:$0xff]  ;;  %v823_v62 = vld [vmem:[%s4071_s5 + $0xc0] sm:$0xff] }
  0x1c   : > { %2458 = vmatprep.subr.bf16.mxu0 %v2457_v3  ;;  %v2495_v60 = vpack.c.bf16 %v822_v58, %v821_v57  ;;  %v824_v63 = vld [vmem:[%s4071_s5 + $0xc8] sm:$0xff]  ;;  %v826_v5 = vld [vmem:[%s4071_s5 + $0xd8] sm:$0xff]  ;;  %v829_v18 = vld [vmem:[%s4071_s5 + $0xf0] sm:$0xff] }
  0x1d   : > { %2460 = vmatpush3.bf16.msra.mxu0 %v2457_v3  ;;  %s2310_s30 = sshll.u32 %s390_s29, 8  ;;  %v2498_v1 = vpack.c.bf16 %v824_v63, %v823_v62  ;;  %v825_v3 = vld [vmem:[%s4071_s5 + $0xd0] sm:$0xff]  ;;  %v1056_v27 = vld [vmem:[%s4072_s6] sm:$0xff]  ;;  %s3843_s29 = sand.u32 1, %s2760_s14  }
  0x1e   : > { %s2919_s19 = scalar_lea.vmem %s4098_s0, %s2310_s30  ;;  %2469 = vmatpush1.bf16.msra.mxu1 %v2468_v15  ;;  %v2501_v7 = vpack.c.bf16 %v826_v5, %v825_v3  ;;  %v827_v15 = vld [vmem:[%s4071_s5 + $0xe0] sm:$0xff]  ;;  %s2307_s30 = sshll.u32 %s2768_s16, 4 }
  0x1f   : > { %v404_v12 = vld [vmem:[%s2919_s19] sm:$0xff]  ;;  %v405_v13 = vld [vmem:[%s2919_s19 + $0x8] sm:$0xff]  ;;  %v406_v14 = vld [vmem:[%s2919_s19 + $0x10] sm:$0xff]  ;;  %2470 = vmatprep.subr.bf16.mxu1 %v2778_v4  ;;  %s387_s11 = scalar_lea.vmem [#allocation5], %s3843_s29  ;;  %s3851_s24 = scalar_lea.hbm %s4076_s10, %s2307_s30 }
  0x20   : > { %2369 = vmatprep.mubr.msk.f32.mxu0 %vm445_vm0, %v404_v12  ;;  %v407_v16 = vld [vmem:[%s2919_s19 + $0x18] sm:$0xff]  ;;  %v408_v19 = vld [vmem:[%s2919_s19 + $0x20] sm:$0xff]  ;;  %v409_v21 = vld [vmem:[%s2919_s19 + $0x28] sm:$0xff]  ;;  %s2123_s12 = sshll.u32 %s387_s11, 4  ;;  %s2093_s27 = scalar_lea.sflag [#allocation6], %s3843_s29  ;;  %s3853_s12 = int_to_ptr.vmem [resolvable:$true] %s2123_s12 }
  0x21   : > { %2370 = vmatmul.mubr.msk.f32.vlgmr.msra.gmra.mrb[0].mxu0 %vm445_vm0, %v405_v13  ;;  %v410_v24 = vld [vmem:[%s2919_s19 + $0x30] sm:$0xff]  ;;  %v411_v26 = vld [vmem:[%s2919_s19 + $0x38] sm:$0xff]  ;;  %v412_v29 = vld [vmem:[%s2919_s19 + $0x40] sm:$0xff]  ;;  %s2666_s28 = scalar_lea.vmem %s3853_s12, 16  ;;  %s2670_s0 = sshll.u32 %s2781_s20, 4  ;;  %s2671_s0 = int_to_ptr.vmem [resolvable:$false] %s2670_s0 }
  0x22   : > { %2372 = vmatprep.mubr.msk.f32.mxu0 %vm445_vm0, %v406_v14  ;;  %2472 = vmatpush1.bf16.msra.mxu1 %v2471_v20  ;;  %v413_v31 = vld [vmem:[%s2919_s19 + $0x48] sm:$0xff]  ;;  %v414_v34 = vld [vmem:[%s2919_s19 + $0x50] sm:$0xff]  ;;  %v415_v36 = vld [vmem:[%s2919_s19 + $0x58] sm:$0xff]  ;;  %p2667_p12 = scmp.ne.s32.totalorder %s3853_s12, %s2666_s28  ;;  %s2672_s30 = scalar_lea.vmem %s2671_s0, 32 }
  0x23   : > { %2473 = vmatprep.subr.bf16.mxu1 %v2778_v4  ;;  %v416_v39 = vld [vmem:[%s2919_s19 + $0x60] sm:$0xff]  ;;  %v417_v41 = vld [vmem:[%s2919_s19 + $0x68] sm:$0xff]  ;;  %v418_v44 = vld [vmem:[%s2919_s19 + $0x70] sm:$0xff]  ;;  %p2673_p1 = scmp.lt.s32.totalorder %s3853_s12, %s2671_s0  ;;  %p2674_p2 = scmp.lt.s32.totalorder %s2672_s30, %s2666_s28 }
  0x24   : > { %v419_v46 = vld [vmem:[%s2919_s19 + $0x78] sm:$0xff]  ;;  %v420_v49 = vld [vmem:[%s2919_s19 + $0x80] sm:$0xff]  ;;  %v421_v51 = vld [vmem:[%s2919_s19 + $0x88] sm:$0xff]  ;;  %p2668_p13 = pnand %p2667_p12, %p2880_p4 }
  0x25   : > { %2373 = vmatmul.mubr.msk.f32.gmra.mrb[2].mxu0 %vm445_vm0, %v407_v16  ;;  %v422_v54 = vld [vmem:[%s2919_s19 + $0x90] sm:$0xff]  ;;  %v423_v56 = vld [vmem:[%s2919_s19 + $0x98] sm:$0xff]  ;;  %v424_v59 = vld [vmem:[%s2919_s19 + $0xa0] sm:$0xff]  ;;  %p2675_p3 = por %p2674_p2, %p2673_p1 }
  0x26   : > { %2375 = vmatprep.mubr.msk.f32.mxu0 %vm445_vm0, %v408_v19  ;;  %2475 = vmatpush1.bf16.msra.mxu1 %v2474_v25  ;;  %v425_v61 = vld [vmem:[%s2919_s19 + $0xa8] sm:$0xff]  ;;  %v426_v0 = vld [vmem:[%s2919_s19 + $0xb0] sm:$0xff]  ;;  %v427_v2 = vld [vmem:[%s2919_s19 + $0xb8] sm:$0xff]  ;;  %p2669_p0 = pneg %p2668_p13 }
  0x27   : > { %2476 = vmatprep.subr.bf16.mxu1 %v2778_v4  ;;  %v428_v6 = vld [vmem:[%s2919_s19 + $0xc0] sm:$0xff]  ;;  %v429_v8 = vld [vmem:[%s2919_s19 + $0xc8] sm:$0xff]  ;;  %v430_v9 = vld [vmem:[%s2919_s19 + $0xd0] sm:$0xff] }
  0x28   : > { %v431_v10 = vld [vmem:[%s2919_s19 + $0xd8] sm:$0xff]  ;;  %v432_v11 = vld [vmem:[%s2919_s19 + $0xe0] sm:$0xff]  ;;  %v433_v12 = vld [vmem:[%s2919_s19 + $0xe8] sm:$0xff]  ;;  %p2676_p5 = pnand %p2675_p3, %p2669_p0 }
  0x29   : > { %2376 = vmatmul.mubr.msk.f32.gmra.mrb[4].mxu0 %vm445_vm0, %v409_v21  ;;  %v434_v13 = vld [vmem:[%s2919_s19 + $0xf0] sm:$0xff]  ;;  %v435_v14 = vld [vmem:[%s2919_s19 + $0xf8] sm:$0xff]  ;;  %v828_v16 = vld [vmem:[%s4071_s5 + $0xe8] sm:$0xff] }
  0x2a   : > { %2378 = vmatprep.mubr.msk.f32.mxu0 %vm445_vm0, %v410_v24  ;;  %2478 = vmatpush1.bf16.msra.mxu1 %v2477_v30  ;;  %v2504_v17 = vpack.c.bf16 %v828_v16, %v827_v15  ;;  %v830_v19 = vld [vmem:[%s4071_s5 + $0xf8] sm:$0xff]  ;;  %v3088_v21 = vld [vmem:[%s4068_s2] ss:$0 sm:$0xff] }
  0x2b   : > { %2479 = vmatprep.subr.bf16.mxu1 %v2778_v4  ;;  %v2507_v20 = vpack.c.bf16 %v830_v19, %v829_v18 }
  0x2d   : > { %2379 = vmatmul.mubr.msk.f32.gmra.mrb[6].mxu0 %vm445_vm0, %v411_v26  ;;  %v1057_v26 = vld [vmem:[%s4072_s6 + $0x8] sm:$0xff] }
  0x2e   : > { %2381 = vmatprep.mubr.msk.f32.mxu0 %vm445_vm0, %v412_v29  ;;  %2481 = vmatpush1.bf16.msra.mxu1 %v2480_v35 }
  0x2f   : > { %2482 = vmatprep.subr.bf16.mxu1 %v2778_v4  ;;  %1155 = vmatprep.subr.mxu0 %v1057_v26 }
  0x30   : > { %1156 = vmatpush1.msra.mxu0 %v1056_v27 }
  0x31   : > { %2382 = vmatmul.mubr.msk.f32.gmra.mrb[8].mxu0 %vm445_vm0, %v413_v31 }
  0x32   : > { %2384 = vmatprep.mubr.msk.f32.mxu0 %vm445_vm0, %v414_v34  ;;  %2484 = vmatpush1.bf16.msra.mxu1 %v2483_v40 }
  0x33   : > { %2485 = vmatprep.subr.bf16.mxu1 %v2778_v4 }
  0x35   : > { %2385 = vmatmul.mubr.msk.f32.gmra.mrb[10].mxu0 %vm445_vm0, %v415_v36 }
  0x36   : > { %2387 = vmatprep.mubr.msk.f32.mxu0 %vm445_vm0, %v416_v39  ;;  %2487 = vmatpush1.bf16.msra.mxu1 %v2486_v45 }
  0x37   : > { %2488 = vmatprep.subr.bf16.mxu1 %v2778_v4 }
  0x39   : > { %2388 = vmatmul.mubr.msk.f32.gmra.mrb[12].mxu0 %vm445_vm0, %v417_v41 }
  0x3a   : > { %2390 = vmatprep.mubr.msk.f32.mxu0 %vm445_vm0, %v418_v44  ;;  %2490 = vmatpush1.bf16.msra.mxu1 %v2489_v50 }
  0x3b   : > { %2491 = vmatprep.subr.bf16.mxu1 %v2778_v4 }
  0x3d   : > { %2391 = vmatmul.mubr.msk.f32.gmra.mrb[14].mxu0 %vm445_vm0, %v419_v46 }
  0x3e   : > { %2393 = vmatprep.mubr.msk.f32.mxu0 %vm445_vm0, %v420_v49  ;;  %2493 = vmatpush1.bf16.msra.mxu1 %v2492_v55 }
  0x3f   : > { %2494 = vmatprep.subr.bf16.mxu1 %v2778_v4 }
  0x41   : > { %2394 = vmatmul.mubr.msk.f32.gmra.mrb[16].mxu0 %vm445_vm0, %v421_v51 }
  0x42   : > { %2396 = vmatprep.mubr.msk.f32.mxu0 %vm445_vm0, %v422_v54  ;;  %2496 = vmatpush1.bf16.msra.mxu1 %v2495_v60 }
  0x43   : > { %2497 = vmatprep.subr.bf16.mxu1 %v2778_v4 }
  0x45   : > { %2397 = vmatmul.mubr.msk.f32.gmra.mrb[18].mxu0 %vm445_vm0, %v423_v56 }
  0x46   : > { %2399 = vmatprep.mubr.msk.f32.mxu0 %vm445_vm0, %v424_v59  ;;  %2499 = vmatpush1.bf16.msra.mxu1 %v2498_v1 }
  0x47   : > { %2500 = vmatprep.subr.bf16.mxu1 %v2778_v4 }
  0x49   : > { %2400 = vmatmul.mubr.msk.f32.gmra.mrb[20].mxu0 %vm445_vm0, %v425_v61 }
  0x4a   : > { %2402 = vmatprep.mubr.msk.f32.mxu0 %vm445_vm0, %v426_v0  ;;  %2502 = vmatpush1.bf16.msra.mxu1 %v2501_v7 }
  0x4b   : > { %2503 = vmatprep.subr.bf16.mxu1 %v2778_v4 }
  0x4d   : > { %2403 = vmatmul.mubr.msk.f32.gmra.mrb[22].mxu0 %vm445_vm0, %v427_v2 }
  0x4e   : > { %2405 = vmatprep.mubr.msk.f32.mxu0 %vm445_vm0, %v428_v6  ;;  %2505 = vmatpush1.bf16.msra.mxu1 %v2504_v17 }
  0x4f   : > { %2506 = vmatprep.subr.bf16.mxu1 %v2778_v4 }
  0x51   : > { %2406 = vmatmul.mubr.msk.f32.gmra.mrb[24].mxu0 %vm445_vm0, %v429_v8 }
  0x52   : > { %2408 = vmatprep.mubr.msk.f32.mxu0 %vm445_vm0, %v430_v9  ;;  %2508 = vmatpush1.bf16.msra.mxu1 %v2507_v20 }
  0x53   : > { %2509 = vmatprep.subr.bf16.mxu1 %v2778_v4 }
  0x55   : > { %2409 = vmatmul.mubr.msk.f32.gmra.mrb[26].mxu0 %vm445_vm0, %v431_v10 }
  0x56   : > { %2411 = vmatprep.mubr.msk.f32.mxu0 %vm445_vm0, %v432_v11 }
  0x59   : > { %2412 = vmatmul.mubr.msk.f32.gmra.mrb[28].mxu0 %vm445_vm0, %v433_v12 }
  0x5a   : > { %2414 = vmatprep.mubr.msk.f32.mxu0 %vm445_vm0, %v434_v13 }
  0x5d   : > { %2415 = vmatmul.mubr.msk.f32.gmra.mrb[30].mxu0 %vm445_vm0, %v435_v14 }
  0xf4   : > { %v2371_v22 = vpop.f32.mrb[0].mxu0 }
  0xf5   : > { %v608_v23 = vpop.f32.mrb[1].mxu0  ;;  %v3091_v24 = vadd.f32 %v2371_v22, %v3088_v21 }
  0xf6   : > { %v3094_v25 = vadd.f32 %v3088_v21, %v608_v23 }
  0xf7   : > { %v768_v32 = vmul.f32 %v3091_v24, %v3091_v24 }
  0xf8   : > { %v767_v28 = vmul.f32 %v3094_v25, %v3094_v25  ;;  %v2374_v29 = vpop.f32.mrb[2].mxu0 }
  0xf9   : > { %v618_v30 = vpop.f32.mrb[3].mxu0  ;;  %v3113_v36 = vadd.f32 %v2374_v29, %v3088_v21 }
  0xfa   : > { %895 = vmatprep.mubr.f32.mxu1 %v767_v28  ;;  %v3105_v31 = vadd.f32 %v3088_v21, %v618_v30 }
  0xfb   : > { %896 = vmatmul.mubr.f32.vlgmr.msra.gmra.mrb[0].mxu1 %v3094_v25  ;;  %v770_v40 = vmul.f32 %v3113_v36, %v3113_v36 }
  0xfc   : > { %900 = vmatprep.mubr.f32.mxu1 %v768_v32  ;;  %v769_v33 = vmul.f32 %v3105_v31, %v3105_v31  ;;  %v2377_v34 = vpop.f32.mrb[4].mxu0 }
  0xfd   : > { %v628_v35 = vpop.f32.mrb[5].mxu0  ;;  %v3125_v44 = vadd.f32 %v2377_v34, %v3088_v21 }
  0xfe   : > { %v3117_v37 = vadd.f32 %v3088_v21, %v628_v35 }
  0xff   : > { %901 = vmatmul.mubr.f32.gmra.mrb[2].mxu1 %v3091_v24  ;;  %v772_v48 = vmul.f32 %v3125_v44, %v3125_v44 }
 0x100   : > { %905 = vmatprep.mubr.f32.mxu1 %v769_v33  ;;  %v2380_v38 = vpop.f32.mrb[6].mxu0  ;;  %v771_v41 = vmul.f32 %v3117_v37, %v3117_v37 }
 0x101   : > { %v638_v39 = vpop.f32.mrb[7].mxu0  ;;  %v3137_v52 = vadd.f32 %v2380_v38, %v3088_v21 }
 0x102   : > { %v3129_v45 = vadd.f32 %v3088_v21, %v638_v39 }
 0x103   : > { %906 = vmatmul.mubr.f32.gmra.mrb[4].mxu1 %v3105_v31  ;;  %v774_v56 = vmul.f32 %v3137_v52, %v3137_v52 }
 0x104   : > { %910 = vmatprep.mubr.f32.mxu1 %v770_v40  ;;  %v2383_v42 = vpop.f32.mrb[8].mxu0  ;;  %v773_v49 = vmul.f32 %v3129_v45, %v3129_v45 }
 0x105   : > { %v648_v43 = vpop.f32.mrb[9].mxu0  ;;  %v3152_v61 = vadd.f32 %v2383_v42, %v3088_v21 }
 0x106   : > { %v3141_v53 = vadd.f32 %v3088_v21, %v648_v43 }
 0x107   : > { %911 = vmatmul.mubr.f32.gmra.mrb[6].mxu1 %v3113_v36  ;;  %v776_v2 = vmul.f32 %v3152_v61, %v3152_v61 }
 0x108   : > { %915 = vmatprep.mubr.f32.mxu1 %v771_v41  ;;  %v2386_v46 = vpop.f32.mrb[10].mxu0  ;;  %v775_v57 = vmul.f32 %v3141_v53, %v3141_v53 }
 0x109   : > { %v658_v47 = vpop.f32.mrb[11].mxu0  ;;  %v3173_v9 = vadd.f32 %v2386_v46, %v3088_v21 }
 0x10a   : > { %v3156_v62 = vadd.f32 %v3088_v21, %v658_v47 }
 0x10b   : > { %916 = vmatmul.mubr.f32.gmra.mrb[8].mxu1 %v3117_v37  ;;  %v778_v15 = vmul.f32 %v3173_v9, %v3173_v9 }
 0x10c   : > { %920 = vmatprep.mubr.f32.mxu1 %v772_v48  ;;  %v2389_v50 = vpop.f32.mrb[12].mxu0  ;;  %v777_v5 = vmul.f32 %v3156_v62, %v3156_v62 }
 0x10d   : > { %v668_v51 = vpop.f32.mrb[13].mxu0  ;;  %v3197_v22 = vadd.f32 %v2389_v50, %v3088_v21 }
 0x10e   : > { %v3180_v11 = vadd.f32 %v3088_v21, %v668_v51 }
 0x10f   : > { %921 = vmatmul.mubr.f32.gmra.mrb[10].mxu1 %v3125_v44  ;;  %v780_v30 = vmul.f32 %v3197_v22, %v3197_v22 }
 0x110   : > { %925 = vmatprep.mubr.f32.mxu1 %v773_v49  ;;  %v2392_v54 = vpop.f32.mrb[14].mxu0  ;;  %v779_v17 = vmul.f32 %v3180_v11, %v3180_v11 }
 0x111   : > { %v678_v55 = vpop.f32.mrb[15].mxu0  ;;  %v3221_v39 = vadd.f32 %v2392_v54, %v3088_v21 }
 0x112   : > { %v3204_v26 = vadd.f32 %v3088_v21, %v678_v55 }
 0x113   : > { %926 = vmatmul.mubr.f32.gmra.mrb[12].mxu1 %v3129_v45  ;;  %v782_v47 = vmul.f32 %v3221_v39, %v3221_v39 }
 0x114   : > { %930 = vmatprep.mubr.f32.mxu1 %v774_v56  ;;  %v2395_v58 = vpop.f32.mrb[16].mxu0  ;;  %v781_v33 = vmul.f32 %v3204_v26, %v3204_v26 }
 0x115   : > { %v3149_v59 = vadd.f32 %v2395_v58, %v3088_v21  ;;  %v688_v60 = vpop.f32.mrb[17].mxu0 }
 0x116   : > { %v3228_v41 = vadd.f32 %v3088_v21, %v688_v60 }
 0x117   : > { %931 = vmatmul.mubr.f32.gmra.mrb[14].mxu1 %v3137_v52  ;;  %v784_v50 = vmul.f32 %v3149_v59, %v3149_v59 }
 0x118   : > { %935 = vmatprep.mubr.f32.mxu1 %v775_v57  ;;  %v2398_v63 = vpop.f32.mrb[18].mxu0  ;;  %v783_v49 = vmul.f32 %v3228_v41, %v3228_v41  ;;  %v2779_v57 = vmov 0.0  }
 0x119   : > { %v3159_v0 = vadd.f32 %v2398_v63, %v3088_v21  ;;  %v698_v1 = vpop.f32.mrb[19].mxu0  ;;  %1219 = vmatprep.mubr.f32.mxu0 %v2779_v57  ;;  %403 = vst [vmem:[#allocation2] sm:$0x1] %v2779_v57  ;;  %2452 = vmatprep.subr.mxu0 %v2779_v57 }
 0x11a   : > { %v3164_v3 = vadd.f32 %v3088_v21, %v698_v1 }
 0x11b   : > { %936 = vmatmul.mubr.f32.gmra.mrb[16].mxu1 %v3141_v53 }
 0x11c   : > { %940 = vmatprep.mubr.f32.mxu1 %v776_v2  ;;  %v2401_v6 = vpop.f32.mrb[20].mxu0  ;;  %v785_v51 = vmul.f32 %v3164_v3, %v3164_v3 }
 0x11d   : > { %v3170_v7 = vadd.f32 %v2401_v6, %v3088_v21  ;;  %v708_v8 = vpop.f32.mrb[21].mxu0 }
 0x11e   : > { %v3176_v10 = vadd.f32 %v3088_v21, %v708_v8 }
 0x11f   : > { %941 = vmatmul.mubr.f32.gmra.mrb[18].mxu1 %v3152_v61  ;;  %v788_v55 = vmul.f32 %v3170_v7, %v3170_v7 }
 0x120   : > { %945 = vmatprep.mubr.f32.mxu1 %v777_v5  ;;  %v2404_v12 = vpop.f32.mrb[22].mxu0  ;;  %v787_v54 = vmul.f32 %v3176_v10, %v3176_v10 }
 0x121   : > { %v3183_v13 = vadd.f32 %v2404_v12, %v3088_v21  ;;  %v718_v14 = vpop.f32.mrb[23].mxu0 }
 0x122   : > { %v3188_v16 = vadd.f32 %v3088_v21, %v718_v14 }
 0x123   : > { %946 = vmatmul.mubr.f32.gmra.mrb[20].mxu1 %v3156_v62  ;;  %v790_v58 = vmul.f32 %v3183_v13, %v3183_v13 }
 0x124   : > { %950 = vmatprep.mubr.f32.mxu1 %v778_v15  ;;  %v2407_v18 = vpop.f32.mrb[24].mxu0  ;;  %v789_v56 = vmul.f32 %v3188_v16, %v3188_v16 }
 0x125   : > { %v3194_v19 = vadd.f32 %v2407_v18, %v3088_v21  ;;  %v728_v20 = vpop.f32.mrb[25].mxu0 }
 0x126   : > { %v3200_v23 = vadd.f32 %v3088_v21, %v728_v20 }
 0x127   : > { %951 = vmatmul.mubr.f32.gmra.mrb[22].mxu1 %v3173_v9  ;;  %v792_v63 = vmul.f32 %v3194_v19, %v3194_v19 }
 0x128   : > { %955 = vmatprep.mubr.f32.mxu1 %v779_v17  ;;  %v2410_v27 = vpop.f32.mrb[26].mxu0  ;;  %v791_v60 = vmul.f32 %v3200_v23, %v3200_v23 }
 0x129   : > { %v3207_v28 = vadd.f32 %v2410_v27, %v3088_v21  ;;  %v738_v29 = vpop.f32.mrb[27].mxu0 }
 0x12a   : > { %v3212_v32 = vadd.f32 %v3088_v21, %v738_v29 }
 0x12b   : > { %956 = vmatmul.mubr.f32.gmra.mrb[24].mxu1 %v3180_v11  ;;  %v794_v2 = vmul.f32 %v3207_v28, %v3207_v28 }
 0x12c   : > { %960 = vmatprep.mubr.f32.mxu1 %v780_v30  ;;  %v2413_v34 = vpop.f32.mrb[28].mxu0  ;;  %v793_v1 = vmul.f32 %v3212_v32, %v3212_v32 }
 0x12d   : > { %v3218_v35 = vadd.f32 %v2413_v34, %v3088_v21  ;;  %v748_v38 = vpop.f32.mrb[29].mxu0 }
 0x12e   : > { %v3224_v40 = vadd.f32 %v3088_v21, %v748_v38 }
 0x12f   : > { %961 = vmatmul.mubr.f32.gmra.mrb[26].mxu1 %v3197_v22  ;;  %v796_v6 = vmul.f32 %v3218_v35, %v3218_v35 }
 0x130   : > { %965 = vmatprep.mubr.f32.mxu1 %v781_v33  ;;  %v2416_v42 = vpop.f32.mrb[30].mxu0  ;;  %v795_v5 = vmul.f32 %v3224_v40, %v3224_v40 }
 0x131   : > { %v3231_v43 = vadd.f32 %v2416_v42, %v3088_v21  ;;  %v758_v46 = vpop.f32.mrb[31].mxu0 }
 0x132   : > { %v3236_v48 = vadd.f32 %v3088_v21, %v758_v46  ;;  %v786_v21 = vmul.f32 %v3159_v0, %v3159_v0 }
 0x133   : > { %966 = vmatmul.mubr.f32.gmra.mrb[28].mxu1 %v3204_v26  ;;  %v798_v12 = vmul.f32 %v3231_v43, %v3231_v43 }
 0x134   : > { %970 = vmatprep.mubr.f32.mxu1 %v782_v47  ;;  %v797_v8 = vmul.f32 %v3236_v48, %v3236_v48 }
 0x137   : > { %971 = vmatmul.mubr.f32.gmra.mrb[30].mxu1 %v3221_v39 }
 0x138   : > { %975 = vmatprep.mubr.f32.mxu1 %v783_v49 }
 0x13b   : > { %976 = vmatmul.mubr.f32.gmra.mrb[32].mxu1 %v3228_v41 }
 0x13c   : > { %980 = vmatprep.mubr.f32.mxu1 %v784_v50 }
 0x13f   : > { %981 = vmatmul.mubr.f32.gmra.mrb[34].mxu1 %v3149_v59 }
 0x140   : > { %985 = vmatprep.mubr.f32.mxu1 %v785_v51 }
 0x143   : > { %986 = vmatmul.mubr.f32.gmra.mrb[36].mxu1 %v3164_v3 }
 0x144   : > { %990 = vmatprep.mubr.f32.mxu1 %v786_v21 }
 0x147   : > { %991 = vmatmul.mubr.f32.gmra.mrb[38].mxu1 %v3159_v0 }
 0x148   : > { %995 = vmatprep.mubr.f32.mxu1 %v787_v54 }
 0x14b   : > { %996 = vmatmul.mubr.f32.gmra.mrb[40].mxu1 %v3176_v10 }
 0x14c   : > { %1000 = vmatprep.mubr.f32.mxu1 %v788_v55 }
 0x14f   : > { %1001 = vmatmul.mubr.f32.gmra.mrb[42].mxu1 %v3170_v7 }
 0x150   : > { %1005 = vmatprep.mubr.f32.mxu1 %v789_v56 }
 0x153   : > { %1006 = vmatmul.mubr.f32.gmra.mrb[44].mxu1 %v3188_v16 }
 0x154   : > { %1010 = vmatprep.mubr.f32.mxu1 %v790_v58 }
 0x157   : > { %1011 = vmatmul.mubr.f32.gmra.mrb[46].mxu1 %v3183_v13 }
 0x158   : > { %1015 = vmatprep.mubr.f32.mxu1 %v791_v60 }
 0x15b   : > { %1016 = vmatmul.mubr.f32.gmra.mrb[48].mxu1 %v3200_v23 }
 0x15c   : > { %1020 = vmatprep.mubr.f32.mxu1 %v792_v63 }
 0x15f   : > { %1021 = vmatmul.mubr.f32.gmra.mrb[50].mxu1 %v3194_v19 }
 0x160   : > { %1025 = vmatprep.mubr.f32.mxu1 %v793_v1 }
 0x163   : > { %1026 = vmatmul.mubr.f32.gmra.mrb[52].mxu1 %v3212_v32 }
 0x164   : > { %1030 = vmatprep.mubr.f32.mxu1 %v794_v2 }
 0x167   : > { %1031 = vmatmul.mubr.f32.gmra.mrb[54].mxu1 %v3207_v28 }
 0x168   : > { %1035 = vmatprep.mubr.f32.mxu1 %v795_v5 }
 0x16b   : > { %1036 = vmatmul.mubr.f32.gmra.mrb[56].mxu1 %v3224_v40 }
 0x16c   : > { %1040 = vmatprep.mubr.f32.mxu1 %v796_v6 }
 0x16f   : > { %1041 = vmatmul.mubr.f32.gmra.mrb[58].mxu1 %v3218_v35 }
 0x170   : > { %1045 = vmatprep.mubr.f32.mxu1 %v797_v8 }
 0x173   : > { %1046 = vmatmul.mubr.f32.gmra.mrb[60].mxu1 %v3236_v48 }
 0x174   : > { %1050 = vmatprep.mubr.f32.mxu1 %v798_v12 }
 0x177   : > { %1051 = vmatmul.mubr.f32.gmra.mrb[62].mxu1 %v3231_v43 }
 0x178   : > { %2449 = vmatprep.mubr.msk.f32.mxu1 %vm2780_vm2, %v2779_v57 }
 0x1ce   : > { %v897_v14 = vpop.f32.mrb[0].mxu1 }
 0x1cf   : > { %v899_v15 = vpop.f32.mrb[1].mxu1  ;;  %2268 = vmatmul.mubr.msk.f32.vlgmr.msra.gmra.mrb[32].mxu0 %vm1058_vm1, %v897_v14 }
 0x1d0   : > { %1225 = vmatprep.mubr.f32.mxu0 %v2779_v57 }
 0x1d2   : > { %v902_v17 = vpop.f32.mrb[2].mxu1 }
 0x1d3   : > { %v904_v18 = vpop.f32.mrb[3].mxu1  ;;  %2269 = vmatmul.mubr.msk.f32.gmra.mrb[34].mxu0 %vm1058_vm1, %v902_v17 }
 0x1d4   : > { %1231 = vmatprep.mubr.f32.mxu0 %v2779_v57 }
 0x1d6   : > { %v907_v20 = vpop.f32.mrb[4].mxu1 }
 0x1d7   : > { %v909_v27 = vpop.f32.mrb[5].mxu1  ;;  %2270 = vmatmul.mubr.msk.f32.gmra.mrb[36].mxu0 %vm1058_vm1, %v907_v20 }
 0x1d8   : > { %1237 = vmatprep.mubr.f32.mxu0 %v2779_v57 }
 0x1da   : > { %v912_v29 = vpop.f32.mrb[6].mxu1 }
 0x1db   : > { %v914_v30 = vpop.f32.mrb[7].mxu1  ;;  %2271 = vmatmul.mubr.msk.f32.gmra.mrb[38].mxu0 %vm1058_vm1, %v912_v29 }
 0x1dc   : > { %1243 = vmatprep.mubr.f32.mxu0 %v2779_v57 }
 0x1de   : > { %v917_v33 = vpop.f32.mrb[8].mxu1 }
 0x1df   : > { %v919_v34 = vpop.f32.mrb[9].mxu1  ;;  %2272 = vmatmul.mubr.msk.f32.gmra.mrb[40].mxu0 %vm1058_vm1, %v917_v33 }
 0x1e0   : > { %1249 = vmatprep.mubr.f32.mxu0 %v2779_v57 }
 0x1e2   : > { %v922_v38 = vpop.f32.mrb[10].mxu1 }
 0x1e3   : > { %v924_v42 = vpop.f32.mrb[11].mxu1  ;;  %2273 = vmatmul.mubr.msk.f32.gmra.mrb[42].mxu0 %vm1058_vm1, %v922_v38 }
 0x1e4   : > { %1255 = vmatprep.mubr.f32.mxu0 %v2779_v57 }
 0x1e6   : > { %v927_v46 = vpop.f32.mrb[12].mxu1 }
 0x1e7   : > { %v929_v47 = vpop.f32.mrb[13].mxu1  ;;  %2274 = vmatmul.mubr.msk.f32.gmra.mrb[44].mxu0 %vm1058_vm1, %v927_v46 }
 0x1e8   : > { %1261 = vmatprep.mubr.f32.mxu0 %v2779_v57 }
 0x1ea   : > { %v932_v49 = vpop.f32.mrb[14].mxu1 }
 0x1eb   : > { %v934_v50 = vpop.f32.mrb[15].mxu1  ;;  %2275 = vmatmul.mubr.msk.f32.gmra.mrb[46].mxu0 %vm1058_vm1, %v932_v49 }
 0x1ec   : > { %1267 = vmatprep.mubr.f32.mxu0 %v2779_v57 }
 0x1ee   : > { %v937_v51 = vpop.f32.mrb[16].mxu1 }
 0x1ef   : > { %v939_v21 = vpop.f32.mrb[17].mxu1  ;;  %2276 = vmatmul.mubr.msk.f32.gmra.mrb[48].mxu0 %vm1058_vm1, %v937_v51 }
 0x1f0   : > { %1273 = vmatprep.mubr.f32.mxu0 %v2779_v57 }
 0x1f2   : > { %v942_v54 = vpop.f32.mrb[18].mxu1 }
 0x1f3   : > { %v944_v55 = vpop.f32.mrb[19].mxu1  ;;  %2277 = vmatmul.mubr.msk.f32.gmra.mrb[50].mxu0 %vm1058_vm1, %v942_v54 }
 0x1f4   : > { %1279 = vmatprep.mubr.f32.mxu0 %v2779_v57 }
 0x1f6   : > { %v947_v56 = vpop.f32.mrb[20].mxu1 }
 0x1f7   : > { %v949_v58 = vpop.f32.mrb[21].mxu1  ;;  %2278 = vmatmul.mubr.msk.f32.gmra.mrb[52].mxu0 %vm1058_vm1, %v947_v56 }
 0x1f8   : > { %1285 = vmatprep.mubr.f32.mxu0 %v2779_v57 }
 0x1fa   : > { %v952_v60 = vpop.f32.mrb[22].mxu1 }
 0x1fb   : > { %v954_v63 = vpop.f32.mrb[23].mxu1  ;;  %2279 = vmatmul.mubr.msk.f32.gmra.mrb[54].mxu0 %vm1058_vm1, %v952_v60 }
 0x1fc   : > { %1291 = vmatprep.mubr.f32.mxu0 %v2779_v57 }
 0x1fe   : > { %v957_v1 = vpop.f32.mrb[24].mxu1 }
 0x1ff   : > { %v959_v2 = vpop.f32.mrb[25].mxu1  ;;  %2280 = vmatmul.mubr.msk.f32.gmra.mrb[56].mxu0 %vm1058_vm1, %v957_v1 }
 0x200   : > { %1297 = vmatprep.mubr.f32.mxu0 %v2779_v57 }
 0x202   : > { %v962_v5 = vpop.f32.mrb[26].mxu1 }
 0x203   : > { %v964_v6 = vpop.f32.mrb[27].mxu1  ;;  %2281 = vmatmul.mubr.msk.f32.gmra.mrb[58].mxu0 %vm1058_vm1, %v962_v5 }
 0x204   : > { %1303 = vmatprep.mubr.f32.mxu0 %v2779_v57 }
 0x206   : > { %v967_v8 = vpop.f32.mrb[28].mxu1 }
 0x207   : > { %v969_v12 = vpop.f32.mrb[29].mxu1  ;;  %2282 = vmatmul.mubr.msk.f32.gmra.mrb[60].mxu0 %vm1058_vm1, %v967_v8 }
 0x208   : > { %1309 = vmatprep.mubr.f32.mxu0 %v2779_v57 }
 0x20a   : > { %v972_v14 = vpop.f32.mrb[30].mxu1 }
 0x20b   : > { %v974_v15 = vpop.f32.mrb[31].mxu1  ;;  %2283 = vmatmul.mubr.msk.f32.gmra.mrb[62].mxu0 %vm1058_vm1, %v972_v14 }
 0x20c   : > { %1315 = vmatprep.mubr.f32.mxu0 %v2779_v57 }
 0x20e   : > { %v977_v17 = vpop.f32.mrb[32].mxu1 }
 0x20f   : > { %v979_v18 = vpop.f32.mrb[33].mxu1  ;;  %2284 = vmatmul.mubr.msk.f32.gmra.mrb[64].mxu0 %vm1058_vm1, %v977_v17 }
 0x210   : > { %1321 = vmatprep.mubr.f32.mxu0 %v2779_v57 }
 0x212   : > { %v982_v20 = vpop.f32.mrb[34].mxu1 }
 0x213   : > { %v984_v27 = vpop.f32.mrb[35].mxu1  ;;  %2285 = vmatmul.mubr.msk.f32.gmra.mrb[66].mxu0 %vm1058_vm1, %v982_v20  ;;  %v1819_v20 = vld [vmem:[%s4073_s7] sm:$0xff] }
 0x214   : > { %1327 = vmatprep.mubr.f32.mxu0 %v2779_v57  ;;  %v1820_v27 = vld [vmem:[%s4073_s7 + $0x8] sm:$0xff] }
 0x216   : > { %v987_v29 = vpop.f32.mrb[36].mxu1 }
 0x217   : > { %v989_v30 = vpop.f32.mrb[37].mxu1  ;;  %2286 = vmatmul.mubr.msk.f32.gmra.mrb[68].mxu0 %vm1058_vm1, %v987_v29  ;;  %v2510_v29 = vpack.c.bf16 %v1820_v27, %v1819_v20 }
 0x218   : > { %1333 = vmatprep.mubr.f32.mxu0 %v2779_v57  ;;  %v1821_v30 = vld [vmem:[%s4073_s7 + $0x10] sm:$0xff] }
 0x219   : > { %2511 = vmatpush3.bf16.msra.mxu1 %v2510_v29 }
 0x21a   : > { %v992_v33 = vpop.f32.mrb[38].mxu1  ;;  %2512 = vmatprep.subr.bf16.mxu1 %v2778_v4 }
 0x21b   : > { %v994_v34 = vpop.f32.mrb[39].mxu1  ;;  %2287 = vmatmul.mubr.msk.f32.gmra.mrb[70].mxu0 %vm1058_vm1, %v992_v33  ;;  %v1822_v33 = vld [vmem:[%s4073_s7 + $0x18] sm:$0xff] }
 0x21c   : > { %1339 = vmatprep.mubr.f32.mxu0 %v2779_v57  ;;  %v2513_v34 = vpack.c.bf16 %v1822_v33, %v1821_v30 }
 0x21e   : > { %v997_v38 = vpop.f32.mrb[40].mxu1  ;;  %2514 = vmatpush3.bf16.msra.mxu1 %v2513_v34 }
 0x21f   : > { %v999_v42 = vpop.f32.mrb[41].mxu1  ;;  %2288 = vmatmul.mubr.msk.f32.gmra.mrb[72].mxu0 %vm1058_vm1, %v997_v38  ;;  %2515 = vmatprep.subr.bf16.mxu1 %v2778_v4  ;;  %v1823_v38 = vld [vmem:[%s4073_s7 + $0x20] sm:$0xff] }
 0x220   : > { %1345 = vmatprep.mubr.f32.mxu0 %v2779_v57  ;;  %v1824_v42 = vld [vmem:[%s4073_s7 + $0x28] sm:$0xff] }
 0x222   : > { %v1002_v46 = vpop.f32.mrb[42].mxu1 }
 0x223   : > { %v1004_v47 = vpop.f32.mrb[43].mxu1  ;;  %2289 = vmatmul.mubr.msk.f32.gmra.mrb[74].mxu0 %vm1058_vm1, %v1002_v46  ;;  %v2516_v46 = vpack.c.bf16 %v1824_v42, %v1823_v38 }
 0x224   : > { %1351 = vmatprep.mubr.f32.mxu0 %v2779_v57  ;;  %v1825_v47 = vld [vmem:[%s4073_s7 + $0x30] sm:$0xff] }
 0x225   : > { %2517 = vmatpush3.bf16.msra.mxu1 %v2516_v46 }
 0x226   : > { %v1007_v49 = vpop.f32.mrb[44].mxu1  ;;  %2518 = vmatprep.subr.bf16.mxu1 %v2778_v4 }
 0x227   : > { %v1009_v50 = vpop.f32.mrb[45].mxu1  ;;  %2290 = vmatmul.mubr.msk.f32.gmra.mrb[76].mxu0 %vm1058_vm1, %v1007_v49  ;;  %v1826_v49 = vld [vmem:[%s4073_s7 + $0x38] sm:$0xff] }
 0x228   : > { %1357 = vmatprep.mubr.f32.mxu0 %v2779_v57  ;;  %v2519_v50 = vpack.c.bf16 %v1826_v49, %v1825_v47 }
 0x22a   : > { %v1012_v51 = vpop.f32.mrb[46].mxu1  ;;  %2520 = vmatpush3.bf16.msra.mxu1 %v2519_v50 }
 0x22b   : > { %v1014_v21 = vpop.f32.mrb[47].mxu1  ;;  %2291 = vmatmul.mubr.msk.f32.gmra.mrb[78].mxu0 %vm1058_vm1, %v1012_v51  ;;  %2521 = vmatprep.subr.bf16.mxu1 %v2778_v4 }
 0x22c   : > { %1363 = vmatprep.mubr.f32.mxu0 %v2779_v57 }
 0x22e   : > { %v1017_v54 = vpop.f32.mrb[48].mxu1 }
 0x22f   : > { %v1019_v55 = vpop.f32.mrb[49].mxu1  ;;  %2292 = vmatmul.mubr.msk.f32.gmra.mrb[80].mxu0 %vm1058_vm1, %v1017_v54 }
 0x230   : > { %1369 = vmatprep.mubr.f32.mxu0 %v2779_v57 }
 0x232   : > { %v1022_v56 = vpop.f32.mrb[50].mxu1 }
 0x233   : > { %v1024_v58 = vpop.f32.mrb[51].mxu1  ;;  %2293 = vmatmul.mubr.msk.f32.gmra.mrb[82].mxu0 %vm1058_vm1, %v1022_v56 }
 0x234   : > { %1375 = vmatprep.mubr.f32.mxu0 %v2779_v57 }
 0x236   : > { %v1027_v60 = vpop.f32.mrb[52].mxu1 }
 0x237   : > { %v1029_v63 = vpop.f32.mrb[53].mxu1  ;;  %2294 = vmatmul.mubr.msk.f32.gmra.mrb[84].mxu0 %vm1058_vm1, %v1027_v60 }
 0x238   : > { %1381 = vmatprep.mubr.f32.mxu0 %v2779_v57 }
 0x23a   : > { %v1032_v1 = vpop.f32.mrb[54].mxu1 }
 0x23b   : > { %v1034_v2 = vpop.f32.mrb[55].mxu1  ;;  %2295 = vmatmul.mubr.msk.f32.gmra.mrb[86].mxu0 %vm1058_vm1, %v1032_v1 }
 0x23c   : > { %1387 = vmatprep.mubr.f32.mxu0 %v2779_v57 }
 0x23e   : > { %v1037_v5 = vpop.f32.mrb[56].mxu1 }
 0x23f   : > { %v1039_v6 = vpop.f32.mrb[57].mxu1  ;;  %2296 = vmatmul.mubr.msk.f32.gmra.mrb[88].mxu0 %vm1058_vm1, %v1037_v5 }
 0x240   : > { %1393 = vmatprep.mubr.f32.mxu0 %v2779_v57  ;;  %v1827_v6 = vld [vmem:[%s4073_s7 + $0x40] sm:$0xff] }
 0x242   : > { %v1042_v8 = vpop.f32.mrb[58].mxu1 }
 0x243   : > { %v1044_v12 = vpop.f32.mrb[59].mxu1  ;;  %2297 = vmatmul.mubr.msk.f32.gmra.mrb[90].mxu0 %vm1058_vm1, %v1042_v8  ;;  %v1828_v8 = vld [vmem:[%s4073_s7 + $0x48] sm:$0xff] }
 0x244   : > { %1399 = vmatprep.mubr.f32.mxu0 %v2779_v57 }
 0x246   : > { %v1047_v14 = vpop.f32.mrb[60].mxu1 }
 0x247   : > { %v1049_v15 = vpop.f32.mrb[61].mxu1  ;;  %2298 = vmatmul.mubr.msk.f32.gmra.mrb[92].mxu0 %vm1058_vm1, %v1047_v14 }
 0x248   : > { %1405 = vmatprep.mubr.f32.mxu0 %v2779_v57 }
 0x24a   : > { %v1052_v17 = vpop.f32.mrb[62].mxu1 }
 0x24b   : > { %v1054_v18 = vpop.f32.mrb[63].mxu1  ;;  %2299 = vmatmul.mubr.msk.f32.gmra.mrb[94].mxu0 %vm1058_vm1, %v1052_v17  ;;  %v2522_v17 = vpack.c.bf16 %v1828_v8, %v1827_v6 }
 0x24c   : > { %2454 = vmatprep.mubr.msk.f32.mxu0 %vm2780_vm2, %v2779_v57 }
 0x24d   : > { %2523 = vmatpush3.bf16.msra.mxu1 %v2522_v17 }
 0x24e   : > { %2524 = vmatprep.subr.bf16.mxu1 %v2778_v4 }
 0x2a2   : > { %v1221_v51 = vpop.f32.mrb[32].mxu0 }
 0x2a3   : > { %v1412_v21 = vmul.f32 %v1221_v51, %v1221_v51  ;;  %v1223_v54 = vpop.f32.mrb[33].mxu0  ;;  %v1572_v50 = vsub.f32 %v3094_v25, %v1221_v51 }
 0x2a5   : > { %v1444_v55 = vsub.f32 %v1223_v54, %v1412_v21 }
 0x2a6   : > { %v1227_v56 = vpop.f32.mrb[34].mxu0 }
 0x2a7   : > { %v1476_v58 = vmax.f32 %v1444_v55, 0.0  ;;  %v1413_v60 = vmul.f32 %v1227_v56, %v1227_v56  ;;  %v1229_v63 = vpop.f32.mrb[35].mxu0  ;;  %v1573_v6 = vsub.f32 %v3091_v24, %v1227_v56 }
 0x2a9   : > { %v1508_v1 = vadd.f32 1e-06, %v1476_v58  ;;  %v1445_v2 = vsub.f32 %v1229_v63, %v1413_v60 }
 0x2aa   : > { %v1233_v5 = vpop.f32.mrb[36].mxu0 }
 0x2ab   : > { %2598 = vrsqrt.f32 %v1508_v1  ;;  %v1477_v12 = vmax.f32 %v1445_v2, 0.0  ;;  %v1414_v14 = vmul.f32 %v1233_v5, %v1233_v5  ;;  %v1235_v15 = vpop.f32.mrb[37].mxu0 }
 0x2ad   : > { %v1509_v18 = vadd.f32 1e-06, %v1477_v12  ;;  %v1446_v20 = vsub.f32 %v1235_v15, %v1414_v14 }
 0x2ae   : > { %v1239_v27 = vpop.f32.mrb[38].mxu0 }
 0x2af   : > { %2600 = vrsqrt.f32 %v1509_v18  ;;  %v1478_v29 = vmax.f32 %v1446_v20, 0.0  ;;  %v1415_v30 = vmul.f32 %v1239_v27, %v1239_v27  ;;  %v1241_v33 = vpop.f32.mrb[39].mxu0  ;;  %v1574_v20 = vsub.f32 %v3105_v31, %v1233_v5 }
 0x2b1   : > { %v1510_v34 = vadd.f32 1e-06, %v1478_v29  ;;  %v1447_v38 = vsub.f32 %v1241_v33, %v1415_v30 }
 0x2b2   : > { %v1245_v42 = vpop.f32.mrb[40].mxu0 }
 0x2b3   : > { %2602 = vrsqrt.f32 %v1510_v34  ;;  %v1479_v46 = vmax.f32 %v1447_v38, 0.0  ;;  %v1416_v47 = vmul.f32 %v1245_v42, %v1245_v42  ;;  %v1247_v49 = vpop.f32.mrb[41].mxu0 }
 0x2b5   : > { %v2599_v21 = vpop.eup %2598  ;;  %v1511_v54 = vadd.f32 1e-06, %v1479_v46  ;;  %v1448_v55 = vsub.f32 %v1247_v49, %v1416_v47  ;;  %v1575_v47 = vsub.f32 %v3113_v36, %v1239_v27  ;;  %v1830_v36 = vld [vmem:[%s4073_s7 + $0x58] sm:$0xff] }
 0x2b6   : > { %v3390_v58 = vmul.f32 %v2599_v21, %v1572_v50  ;;  %v1251_v60 = vpop.f32.mrb[42].mxu0 }
 0x2b7   : > { %2604 = vrsqrt.f32 %v1511_v54  ;;  %v1480_v63 = vmax.f32 %v1448_v55, 0.0  ;;  %v1417_v1 = vmul.f32 %v1251_v60, %v1251_v60  ;;  %v1253_v2 = vpop.f32.mrb[43].mxu0 }
 0x2b9   : > { %v2601_v8 = vpop.eup %2600  ;;  %v1512_v12 = vadd.f32 1e-06, %v1480_v63  ;;  %v1449_v14 = vsub.f32 %v1253_v2, %v1417_v1  ;;  %v1576_v1 = vsub.f32 %v3117_v37, %v1245_v42  ;;  %v1829_v2 = vld [vmem:[%s4073_s7 + $0x50] sm:$0xff] }
 0x2ba   : > { %v3393_v15 = vmul.f32 %v2601_v8, %v1573_v6  ;;  %v3395_v17 = vpop.f32.mrb[44].mxu0 }
 0x2bb   : > { %2606 = vrsqrt.f32 %v1512_v12  ;;  %v1481_v25 = vmax.f32 %v1449_v14, 0.0  ;;  %v1418_v51 = vmul.f32 %v3395_v17, %v3395_v17  ;;  %v1259_v18 = vpop.f32.mrb[45].mxu0  ;;  %v2525_v12 = vpack.c.bf16 %v1830_v36, %v1829_v2 }
 0x2bd   : > { %v2603_v29 = vpop.eup %2602  ;;  %v1513_v30 = vadd.f32 1e-06, %v1481_v25  ;;  %v1450_v33 = vsub.f32 %v1259_v18, %v1418_v51  ;;  %2526 = vmatpush3.bf16.msra.mxu1 %v2525_v12  ;;  %v1577_v18 = vsub.f32 %v3125_v44, %v1251_v60  ;;  %v1833_v44 = vld [vmem:[%s4073_s7 + $0x70] sm:$0xff]  ;;  %v1834_v60 = vld [vmem:[%s4073_s7 + $0x78] sm:$0xff] }
 0x2be   : > { %v3400_v34 = vmul.f32 %v2603_v29, %v1574_v20  ;;  %v3402_v24 = vpop.f32.mrb[46].mxu0  ;;  %2527 = vmatprep.subr.bf16.mxu1 %v2778_v4  ;;  %v1831_v20 = vld [vmem:[%s4073_s7 + $0x60] sm:$0xff]  ;;  %v1832_v29 = vld [vmem:[%s4073_s7 + $0x68] sm:$0xff] }
 0x2bf   : > { %2608 = vrsqrt.f32 %v1513_v30  ;;  %v1482_v56 = vmax.f32 %v1450_v33, 0.0  ;;  %v1419_v38 = vmul.f32 %v3402_v24, %v3402_v24  ;;  %v1265_v46 = vpop.f32.mrb[47].mxu0 }
 0x2c1   : > { %v2605_v49 = vpop.eup %2604  ;;  %v1514_v50 = vadd.f32 1e-06, %v1482_v56  ;;  %v1451_v21 = vsub.f32 %v1265_v46, %v1419_v38  ;;  %v2528_v38 = vpack.c.bf16 %v1832_v29, %v1831_v20 }
 0x2c2   : > { %v3407_v54 = vmul.f32 %v2605_v49, %v1575_v47  ;;  %v3409_v31 = vpop.f32.mrb[48].mxu0 }
 0x2c3   : > { %2610 = vrsqrt.f32 %v1514_v50  ;;  %v1483_v5 = vmax.f32 %v1451_v21, 0.0  ;;  %v1420_v55 = vmul.f32 %v3409_v31, %v3409_v31  ;;  %v1271_v63 = vpop.f32.mrb[49].mxu0  ;;  %2529 = vmatpush3.bf16.msra.mxu1 %v2528_v38 }
 0x2c4   : > { %2530 = vmatprep.subr.bf16.mxu1 %v2778_v4 }
 0x2c5   : > { %v2607_v27 = vpop.eup %2606  ;;  %v1515_v6 = vadd.f32 1e-06, %v1483_v5  ;;  %v1452_v8 = vsub.f32 %v1271_v63, %v1420_v55  ;;  %v1578_v5 = vsub.f32 %v3129_v45, %v3395_v17  ;;  %v2531_v55 = vpack.c.bf16 %v1834_v60, %v1833_v44 }
 0x2c6   : > { %v3420_v14 = vmul.f32 %v2607_v27, %v1576_v1  ;;  %v3422_v25 = vpop.f32.mrb[50].mxu0 }
 0x2c7   : > { %2612 = vrsqrt.f32 %v1515_v6  ;;  %v1484_v51 = vmax.f32 %v1452_v8, 0.0  ;;  %v1421_v37 = vmul.f32 %v3422_v25, %v3422_v25  ;;  %v1277_v42 = vpop.f32.mrb[51].mxu0  ;;  %2532 = vmatpush3.bf16.msra.mxu1 %v2531_v55 }
 0x2c9   : > { %v2609_v30 = vpop.eup %2608  ;;  %v1516_v33 = vadd.f32 1e-06, %v1484_v51  ;;  %v1453_v56 = vsub.f32 %v1277_v42, %v1421_v37  ;;  %v1579_v51 = vsub.f32 %v3137_v52, %v3402_v24  ;;  %v1906_v42 = vld [vmem:[%s4074_s8] sm:$0xff] }
 0x2ca   : > { %v3434_v46 = vmul.f32 %v2609_v30, %v1577_v18  ;;  %v1281_v47 = vpop.f32.mrb[52].mxu0  ;;  %2453 = vmatpush3.msra.mxu0 %v1906_v42  ;;  %v1580_v30 = vsub.f32 %v3141_v53, %v3409_v31 }
 0x2cb   : > { %2614 = vrsqrt.f32 %v1516_v33  ;;  %v1485_v49 = vmax.f32 %v1453_v56, 0.0  ;;  %v1422_v50 = vmul.f32 %v1281_v47, %v1281_v47  ;;  %v1283_v21 = vpop.f32.mrb[53].mxu0 }
 0x2cd   : > { %v2611_v63 = vpop.eup %2610  ;;  %v1517_v1 = vadd.f32 1e-06, %v1485_v49  ;;  %v1454_v2 = vsub.f32 %v1283_v21, %v1422_v50  ;;  %v1581_v50 = vsub.f32 %v3152_v61, %v3422_v25 }
 0x2ce   : > { %v3447_v36 = vmul.f32 %v2611_v63, %v1578_v5  ;;  %v1287_v27 = vpop.f32.mrb[54].mxu0 }
 0x2cf   : > { %2616 = vrsqrt.f32 %v1517_v1  ;;  %v1486_v6 = vmax.f32 %v1454_v2, 0.0  ;;  %v1423_v8 = vmul.f32 %v1287_v27, %v1287_v27  ;;  %v1289_v12 = vpop.f32.mrb[55].mxu0  ;;  %v1583_v42 = vsub.f32 %v3173_v9, %v1287_v27 }
 0x2d1   : > { %v2613_v45 = vpop.eup %2612  ;;  %v1518_v17 = vadd.f32 1e-06, %v1486_v6  ;;  %v1455_v4 = vsub.f32 %v1289_v12, %v1423_v8  ;;  %v1582_v6 = vsub.f32 %v3156_v62, %v1281_v47 }
 0x2d2   : > { %v3451_v37 = vmul.f32 %v2613_v45, %v1579_v51  ;;  %v1293_v57 = vpop.f32.mrb[56].mxu0 }
 0x2d3   : > { %2618 = vrsqrt.f32 %v1518_v17  ;;  %v1487_v18 = vmax.f32 %v1455_v4, 0.0  ;;  %v1424_v20 = vmul.f32 %v1293_v57, %v1293_v57  ;;  %v1295_v29 = vpop.f32.mrb[57].mxu0 }
 0x2d5   : > { %v2615_v33 = vpop.eup %2614  ;;  %v1519_v52 = vadd.f32 1e-06, %v1487_v18  ;;  %v1456_v24 = vsub.f32 %v1295_v29, %v1424_v20 }
 0x2d6   : > { %v3458_v56 = vmul.f32 %v2615_v33, %v1580_v30  ;;  %v1299_v38 = vpop.f32.mrb[58].mxu0 }
 0x2d7   : > { %2620 = vrsqrt.f32 %v1519_v52  ;;  %v1488_v44 = vmax.f32 %v1456_v24, 0.0  ;;  %v1425_v60 = vmul.f32 %v1299_v38, %v1299_v38  ;;  %v1301_v49 = vpop.f32.mrb[59].mxu0  ;;  %v1584_v24 = vsub.f32 %v3180_v11, %v1293_v57  ;;  %v3489_v57 = vld [vmem:[%s4069_s3] ss:$0 sm:$0xff] }
 0x2d9   : > { %v2617_v21 = vpop.eup %2616  ;;  %v1520_v5 = vadd.f32 1e-06, %v1488_v44  ;;  %v1457_v55 = vsub.f32 %v1301_v49, %v1425_v60 }
 0x2da   : > { %v3462_v63 = vmul.f32 %v2617_v21, %v1581_v50  ;;  %v1305_v1 = vpop.f32.mrb[60].mxu0 }
 0x2db   : > { %2622 = vrsqrt.f32 %v1520_v5  ;;  %v1489_v53 = vmax.f32 %v1457_v55, 0.0  ;;  %v1426_v31 = vmul.f32 %v1305_v1, %v1305_v1  ;;  %v1307_v2 = vpop.f32.mrb[61].mxu0  ;;  %v1585_v55 = vsub.f32 %v3197_v22, %v1299_v38 }
 0x2dc   : > { %v1644_v22 = vmul.f32 %v3489_v57, %v3393_v15  ;;  %v1586_v38 = vsub.f32 %v3204_v26, %v1305_v1 }
 0x2dd   : > { %v2619_v8 = vpop.eup %2618  ;;  %v1521_v12 = vadd.f32 1e-06, %v1489_v53  ;;  %v1458_v51 = vsub.f32 %v1307_v2, %v1426_v31 }
 0x2de   : > { %v3465_v45 = vmul.f32 %v2619_v8, %v1582_v6  ;;  %v1311_v17 = vpop.f32.mrb[62].mxu0 }
 0x2df   : > { %2624 = vrsqrt.f32 %v1521_v12  ;;  %v1490_v61 = vmax.f32 %v1458_v51, 0.0  ;;  %v1427_v25 = vmul.f32 %v1311_v17, %v1311_v17  ;;  %v1313_v4 = vpop.f32.mrb[63].mxu0 }
 0x2e1   : > { %v2621_v18 = vpop.eup %2620  ;;  %v1522_v20 = vadd.f32 1e-06, %v1490_v61  ;;  %v1459_v29 = vsub.f32 %v1313_v4, %v1427_v25 }
 0x2e2   : > { %v3468_v30 = vmul.f32 %v2621_v18, %v1583_v42  ;;  %v3470_v33 = vpop.f32.mrb[64].mxu0  ;;  %v1643_v42 = vmul.f32 %v3489_v57, %v3390_v58  ;;  %v1645_v18 = vmul.f32 %v3489_v57, %v3400_v34  ;;  %v1587_v34 = vsub.f32 %v3221_v39, %v1311_v17 }
 0x2e3   : > { %2626 = vrsqrt.f32 %v1522_v20  ;;  %v1491_v62 = vmax.f32 %v1459_v29, 0.0  ;;  %v1428_v47 = vmul.f32 %v3470_v33, %v3470_v33  ;;  %v1319_v52 = vpop.f32.mrb[65].mxu0 }
 0x2e5   : > { %v2623_v44 = vpop.eup %2622  ;;  %v1523_v60 = vadd.f32 1e-06, %v1491_v62  ;;  %v1460_v49 = vsub.f32 %v1319_v52, %v1428_v47  ;;  %v3507_v62 = vld [vmem:[%s4070_s4] ss:$0 sm:$0xff]  ;;  %v1646_v52 = vmul.f32 %v3489_v57, %v3407_v54 }
 0x2e6   : > { %v3475_v50 = vmul.f32 %v2623_v44, %v1584_v24  ;;  %v3477_v9 = vpop.f32.mrb[66].mxu0  ;;  %v3512_v58 = vadd.f32 %v3507_v62, %v1644_v22 }
 0x2e7   : > { %2628 = vrsqrt.f32 %v1523_v60  ;;  %v1492_v27 = vmax.f32 %v1460_v49, 0.0  ;;  %v1429_v21 = vmul.f32 %v3477_v9, %v3477_v9  ;;  %v1325_v5 = vpop.f32.mrb[67].mxu0  ;;  %v3518_v60 = vadd.f32 %v3507_v62, %v1643_v42 }
 0x2e8   : > { %v3521_v49 = vadd.f32 %v3507_v62, %v1645_v18  ;;  %v1649_v42 = vmul.f32 %v3489_v57, %v3447_v36  ;;  %v1589_v18 = vsub.f32 %v3149_v59, %v3477_v9 }
 0x2e9   : > { %v2625_v53 = vpop.eup %2624  ;;  %v1524_v31 = vadd.f32 1e-06, %v1492_v27  ;;  %v1461_v2 = vsub.f32 %v1325_v5, %v1429_v21  ;;  %v1647_v5 = vmul.f32 %v3489_v57, %v3420_v14 }
 0x2ea   : > { %v3482_v6 = vmul.f32 %v2625_v53, %v1585_v55  ;;  %v3484_v11 = vpop.f32.mrb[68].mxu0  ;;  %v1715_v55 = vmax.f32 %v3512_v58, 0.0  ;;  %v1588_v53 = vsub.f32 %v3228_v41, %v3470_v33  ;;  %v1716_v22 = vmax.f32 %v3521_v49, 0.0 }
 0x2eb   : > { %2630 = vrsqrt.f32 %v1524_v31  ;;  %v1493_v8 = vmax.f32 %v1461_v2, 0.0  ;;  %v1430_v12 = vmul.f32 %v3484_v11, %v3484_v11  ;;  %v1331_v51 = vpop.f32.mrb[69].mxu0  ;;  %v3535_v2 = vadd.f32 %v3507_v62, %v1646_v52 }
 0x2ed   : > { %v2627_v61 = vpop.eup %2626  ;;  %v1525_v25 = vadd.f32 1e-06, %v1493_v8  ;;  %v1462_v4 = vsub.f32 %v1331_v51, %v1430_v12  ;;  %v1648_v8 = vmul.f32 %v3489_v57, %v3434_v46  ;;  %v1714_v51 = vmax.f32 %v3518_v60, 0.0 }
 0x2ee   : > { %v3500_v20 = vmul.f32 %v2627_v61, %v1586_v38  ;;  %v3502_v29 = vpop.f32.mrb[70].mxu0 }
 0x2ef   : > { %2632 = vrsqrt.f32 %v1525_v25  ;;  %v1494_v26 = vmax.f32 %v1462_v4, 0.0  ;;  %v1431_v15 = vmul.f32 %v3502_v29, %v3502_v29  ;;  %v1337_v1 = vpop.f32.mrb[71].mxu0  ;;  %v3546_v25 = vadd.f32 %v3507_v62, %v1647_v5 }
 0x2f0   : > { %v1747_v46 = vadd.f32 %v1715_v55, %v1714_v51 }
 0x2f1   : > { %v2629_v47 = vpop.eup %2628  ;;  %v1526_v24 = vadd.f32 1e-06, %v1494_v26  ;;  %v1463_v44 = vsub.f32 %v1337_v1, %v1431_v15  ;;  %v1717_v15 = vmax.f32 %v3535_v2, 0.0  ;;  %v3560_v1 = vadd.f32 %v3507_v62, %v1648_v8 }
 0x2f2   : > { %v3523_v27 = vmul.f32 %v2629_v47, %v1587_v34  ;;  %v3525_v21 = vpop.f32.mrb[72].mxu0  ;;  %v1748_v52 = vadd.f32 %v1747_v46, %v1716_v22  ;;  %v1718_v59 = vmax.f32 %v3546_v25, 0.0 }
 0x2f3   : > { %2634 = vrsqrt.f32 %v1526_v24  ;;  %v1495_v39 = vmax.f32 %v1463_v44, 0.0  ;;  %v1432_v54 = vmul.f32 %v3525_v21, %v3525_v21  ;;  %v1343_v17 = vpop.f32.mrb[73].mxu0  ;;  %v1650_v24 = vmul.f32 %v3489_v57, %v3451_v37 }
 0x2f4   : > { %v1590_v37 = vsub.f32 %v3164_v3, %v3484_v11  ;;  %v1719_v8 = vmax.f32 %v3560_v1, 0.0 }
 0x2f5   : > { %v2631_v31 = vpop.eup %2630  ;;  %v1527_v12 = vadd.f32 1e-06, %v1495_v39  ;;  %v1464_v14 = vsub.f32 %v1343_v17, %v1432_v54  ;;  %v3574_v54 = vadd.f32 %v3507_v62, %v1649_v42  ;;  %v1651_v17 = vmul.f32 %v3489_v57, %v3458_v56 }
 0x2f6   : > { %v3541_v38 = vmul.f32 %v2631_v31, %v1588_v53  ;;  %v3543_v61 = vpop.f32.mrb[74].mxu0  ;;  %v1749_v31 = vadd.f32 %v1748_v52, %v1717_v15 }
 0x2f7   : > { %2636 = vrsqrt.f32 %v1527_v12  ;;  %v1496_v41 = vmax.f32 %v1464_v14, 0.0  ;;  %v1433_v33 = vmul.f32 %v3543_v61, %v3543_v61  ;;  %v1349_v4 = vpop.f32.mrb[75].mxu0 }
 0x2f8   : > { %v1750_v3 = vadd.f32 %v1749_v31, %v1718_v59 }
 0x2f9   : > { %v2633_v26 = vpop.eup %2632  ;;  %v1528_v34 = vadd.f32 1e-06, %v1496_v41  ;;  %v1465_v47 = vsub.f32 %v1349_v4, %v1433_v33  ;;  %v3584_v41 = vadd.f32 %v3507_v62, %v1650_v24  ;;  %v1652_v33 = vmul.f32 %v3489_v57, %v3462_v63 }
 0x2fa   : > { %v3566_v44 = vmul.f32 %v2633_v26, %v1589_v18  ;;  %v3568_v36 = vpop.f32.mrb[76].mxu0  ;;  %v1720_v18 = vmax.f32 %v3574_v54, 0.0  ;;  %v3598_v26 = vadd.f32 %v3507_v62, %v1651_v17  ;;  %v1653_v63 = vmul.f32 %v3489_v57, %v3465_v45 }
 0x2fb   : > { %2638 = vrsqrt.f32 %v1528_v34  ;;  %v1497_v9 = vmax.f32 %v1465_v47, 0.0  ;;  %v1434_v5 = vmul.f32 %v3568_v36, %v3568_v36  ;;  %v1355_v39 = vpop.f32.mrb[77].mxu0  ;;  %v1591_v34 = vsub.f32 %v3159_v0, %v3502_v29 }
 0x2fc   : > { %v1751_v52 = vadd.f32 %v1750_v3, %v1719_v8  ;;  %v1654_v17 = vmul.f32 %v3489_v57, %v3468_v30  ;;  %v1592_v30 = vsub.f32 %v3176_v10, %v3525_v21  ;;  %v1655_v3 = vmul.f32 %v3489_v57, %v3475_v50 }
 0x2fd   : > { %v2635_v53 = vpop.eup %2634  ;;  %v1529_v12 = vadd.f32 1e-06, %v1497_v9  ;;  %v1466_v14 = vsub.f32 %v1355_v39, %v1434_v5  ;;  %v4087_v5 = vmax.f32 %v3584_v41, 0.0  ;;  %v3608_v39 = vadd.f32 %v3507_v62, %v1652_v33 }
 0x2fe   : > { %v3588_v4 = vmul.f32 %v2635_v53, %v1590_v37  ;;  %v3590_v56 = vpop.f32.mrb[78].mxu0  ;;  %v1752_v31 = vadd.f32 %v1751_v52, %v1720_v18  ;;  %v1656_v10 = vmul.f32 %v3489_v57, %v3482_v6  ;;  %v1657_v6 = vmul.f32 %v3489_v57, %v3500_v20 }
 0x2ff   : > { %2640 = vrsqrt.f32 %v1529_v12  ;;  %v1498_v11 = vmax.f32 %v1466_v14, 0.0  ;;  %v1435_v46 = vmul.f32 %v3590_v56, %v3590_v56  ;;  %v1361_v42 = vpop.f32.mrb[79].mxu0  ;;  %v4080_v12 = vmax.f32 %v3598_v26, 0.0 }
 0x300   : > { %v3622_v14 = vadd.f32 %v3507_v62, %v1653_v63 }
 0x301   : > { %v2637_v47 = vpop.eup %2636  ;;  %v1530_v24 = vadd.f32 1e-06, %v1498_v11  ;;  %v1467_v9 = vsub.f32 %v1361_v42, %v1435_v46  ;;  %v1753_v42 = vadd.f32 %v1752_v31, %v4087_v5 }
 0x302   : > { %v3612_v37 = vmul.f32 %v2637_v47, %v1591_v34  ;;  %v3614_v45 = vpop.f32.mrb[80].mxu0  ;;  %v4078_v34 = vmax.f32 %v3608_v39, 0.0  ;;  %v3632_v47 = vadd.f32 %v3507_v62, %v1654_v17  ;;  %v1593_v17 = vsub.f32 %v3170_v7, %v3543_v61 }
 0x303   : > { %2642 = vrsqrt.f32 %v1530_v24  ;;  %v1499_v0 = vmax.f32 %v1467_v9, 0.0  ;;  %v1436_v29 = vmul.f32 %v3614_v45, %v3614_v45  ;;  %v1367_v53 = vpop.f32.mrb[81].mxu0  ;;  %v1754_v9 = vadd.f32 %v1753_v42, %v4080_v12 }
 0x304   : > { %v3660_v7 = vadd.f32 %v3507_v62, %v1656_v10  ;;  %v3672_v10 = vadd.f32 %v3507_v62, %v1657_v6 }
 0x305   : > { %v2639_v33 = vpop.eup %2638  ;;  %v1531_v11 = vadd.f32 1e-06, %v1499_v0  ;;  %v1468_v46 = vsub.f32 %v1367_v53, %v1436_v29  ;;  %v4077_v0 = vmax.f32 %v3622_v14, 0.0  ;;  %v3648_v53 = vadd.f32 %v3507_v62, %v1655_v3 }
 0x306   : > { %v3634_v52 = vmul.f32 %v2639_v33, %v1592_v30  ;;  %v3636_v63 = vpop.f32.mrb[82].mxu0  ;;  %v1755_v33 = vadd.f32 %v1754_v9, %v4078_v34 }
 0x307   : > { %2644 = vrsqrt.f32 %v1531_v11  ;;  %v1500_v21 = vmax.f32 %v1468_v46, 0.0  ;;  %v1437_v50 = vmul.f32 %v3636_v63, %v3636_v63  ;;  %v1373_v24 = vpop.f32.mrb[83].mxu0  ;;  %v4079_v11 = vmax.f32 %v3632_v47, 0.0 }
 0x309   : > { %v2641_v29 = vpop.eup %2640  ;;  %v1532_v31 = vadd.f32 1e-06, %v1500_v21  ;;  %v1469_v30 = vsub.f32 %v1373_v24, %v1437_v50  ;;  %v1756_v21 = vadd.f32 %v1755_v33, %v4077_v0  ;;  %v1658_v50 = vmul.f32 %v3489_v57, %v3523_v27 }
 0x30a   : > { %v3655_v46 = vmul.f32 %v2641_v29, %v1593_v17  ;;  %v3657_v42 = vpop.f32.mrb[84].mxu0  ;;  %v1594_v24 = vsub.f32 %v3188_v16, %v3568_v36  ;;  %v4082_v17 = vmax.f32 %v3648_v53, 0.0  ;;  %v1659_v33 = vmul.f32 %v3489_v57, %v3541_v38 }
 0x30b   : > { %2646 = vrsqrt.f32 %v1532_v31  ;;  %v1501_v61 = vmax.f32 %v1469_v30, 0.0  ;;  %v1438_v3 = vmul.f32 %v3657_v42, %v3657_v42  ;;  %v1379_v20 = vpop.f32.mrb[85].mxu0  ;;  %v1757_v30 = vadd.f32 %v1756_v21, %v4079_v11 }
 0x30c   : > { %v4081_v27 = vmax.f32 %v3660_v7, 0.0  ;;  %v1595_v38 = vsub.f32 %v3183_v13, %v3590_v56 }
 0x30d   : > { %v2643_v9 = vpop.eup %2642  ;;  %v1533_v29 = vadd.f32 1e-06, %v1501_v61  ;;  %v1470_v31 = vsub.f32 %v1379_v20, %v1438_v3  ;;  %v3684_v61 = vadd.f32 %v3507_v62, %v1658_v50  ;;  %v1660_v3 = vmul.f32 %v3489_v57, %v3566_v44 }
 0x30e   : > { %v1626_v0 = vmul.f32 %v2643_v9, %v1594_v24  ;;  %v3678_v34 = vpop.f32.mrb[86].mxu0  ;;  %v1758_v21 = vadd.f32 %v1757_v30, %v4082_v17  ;;  %v4084_v24 = vmax.f32 %v3672_v10, 0.0  ;;  %v1661_v50 = vmul.f32 %v3489_v57, %v3588_v4 }
 0x30f   : > { %2648 = vrsqrt.f32 %v1533_v29  ;;  %v1502_v16 = vmax.f32 %v1470_v31, 0.0  ;;  %v1439_v36 = vmul.f32 %v3678_v34, %v3678_v34  ;;  %v1385_v6 = vpop.f32.mrb[87].mxu0  ;;  %v3694_v31 = vadd.f32 %v3507_v62, %v1659_v33 }
 0x310   : > { %v1759_v13 = vadd.f32 %v1758_v21, %v4081_v27  ;;  %v3706_v33 = vadd.f32 %v3507_v62, %v1660_v3  ;;  %v1596_v4 = vsub.f32 %v3200_v23, %v3614_v45  ;;  %v1663_v3 = vmul.f32 %v3489_v57, %v3634_v52 }
 0x311   : > { %v2645_v20 = vpop.eup %2644  ;;  %v1534_v9 = vadd.f32 1e-06, %v1502_v16  ;;  %v1471_v29 = vsub.f32 %v1385_v6, %v1439_v36  ;;  %v4083_v16 = vmax.f32 %v3684_v61, 0.0 }
 0x312   : > { %v1627_v11 = vmul.f32 %v2645_v20, %v1595_v38  ;;  %v3698_v12 = vpop.f32.mrb[88].mxu0  ;;  %v1760_v6 = vadd.f32 %v1759_v13, %v4084_v24  ;;  %v1662_v38 = vmul.f32 %v3489_v57, %v3612_v37 }
 0x313   : > { %2650 = vrsqrt.f32 %v1534_v9  ;;  %v1503_v44 = vmax.f32 %v1471_v29, 0.0  ;;  %v1440_v56 = vmul.f32 %v3698_v12, %v3698_v12  ;;  %v1391_v30 = vpop.f32.mrb[89].mxu0  ;;  %v4085_v9 = vmax.f32 %v3694_v31, 0.0 }
 0x314   : > { %v3716_v29 = vadd.f32 %v3507_v62, %v1661_v50  ;;  %v1761_v37 = vadd.f32 %v1760_v6, %v4083_v16  ;;  %v1597_v50 = vsub.f32 %v3194_v19, %v3636_v63  ;;  %v3730_v52 = vadd.f32 %v3507_v62, %v1662_v38 }
 0x315   : > { %v2647_v36 = vpop.eup %2646  ;;  %v1535_v20 = vadd.f32 1e-06, %v1503_v44  ;;  %v1472_v21 = vsub.f32 %v1391_v30, %v1440_v56  ;;  %v4086_v44 = vmax.f32 %v3706_v33, 0.0  ;;  %v1664_v30 = vmul.f32 %v3489_v57, %v3655_v46 }
 0x316   : > { %v1628_v27 = vmul.f32 %v2647_v36, %v1596_v4  ;;  %v3720_v17 = vpop.f32.mrb[90].mxu0  ;;  %v3738_v6 = vadd.f32 %v3507_v62, %v1663_v3  ;;  %v1665_v19 = vmul.f32 %v3489_v57, %v1626_v0  ;;  %v1733_v3 = vmax.f32 %v3730_v52, 0.0 }
 0x317   : > { %2652 = vrsqrt.f32 %v1535_v20  ;;  %v1504_v23 = vmax.f32 %v1472_v21, 0.0  ;;  %v1441_v45 = vmul.f32 %v3720_v17, %v3720_v17  ;;  %v1397_v13 = vpop.f32.mrb[91].mxu0  ;;  %v1762_v20 = vadd.f32 %v1761_v37, %v4085_v9 }
 0x318   : > { %v1732_v21 = vmax.f32 %v3716_v29, 0.0  ;;  %v3751_v37 = vadd.f32 %v3507_v62, %v1664_v30  ;;  %v1667_v30 = vmul.f32 %v3489_v57, %v1628_v27 }
 0x319   : > { %v2649_v56 = vpop.eup %2648  ;;  %v1536_v4 = vadd.f32 1e-06, %v1504_v23  ;;  %v1473_v36 = vsub.f32 %v1397_v13, %v1441_v45  ;;  %v1763_v23 = vadd.f32 %v1762_v20, %v4086_v44  ;;  %v1598_v45 = vsub.f32 %v3212_v32, %v3657_v42 }
 0x31a   : > { %v1629_v16 = vmul.f32 %v2649_v56, %v1597_v50  ;;  %v3740_v24 = vpop.f32.mrb[92].mxu0  ;;  %v3758_v44 = vadd.f32 %v3507_v62, %v1665_v19 }
 0x31b   : > { %2654 = vrsqrt.f32 %v1536_v4  ;;  %v1505_v63 = vmax.f32 %v1473_v36, 0.0  ;;  %v1442_v46 = vmul.f32 %v3740_v24, %v3740_v24  ;;  %v1403_v38 = vpop.f32.mrb[93].mxu0  ;;  %v1764_v56 = vadd.f32 %v1763_v23, %v1732_v21 }
 0x31c   : > { %v1734_v4 = vmax.f32 %v3738_v6, 0.0  ;;  %v1666_v36 = vmul.f32 %v3489_v57, %v1627_v11  ;;  %v1735_v11 = vmax.f32 %v3751_v37, 0.0 }
 0x31d   : > { %v2651_v13 = vpop.eup %2650  ;;  %v1537_v50 = vadd.f32 1e-06, %v1505_v63  ;;  %v1474_v0 = vsub.f32 %v1403_v38, %v1442_v46  ;;  %v1599_v63 = vsub.f32 %v3207_v28, %v3678_v34  ;;  %v1765_v38 = vadd.f32 %v1764_v56, %v1733_v3 }
 0x31e   : > { %v1630_v9 = vmul.f32 %v2651_v13, %v1598_v45  ;;  %v1407_v20 = vpop.f32.mrb[94].mxu0  ;;  %v3767_v19 = vadd.f32 %v3507_v62, %v1666_v36  ;;  %v1668_v13 = vmul.f32 %v3489_v57, %v1629_v16  ;;  %v3774_v34 = vadd.f32 %v3507_v62, %v1667_v30 }
 0x31f   : > { %2656 = vrsqrt.f32 %v1537_v50  ;;  %v1506_v32 = vmax.f32 %v1474_v0, 0.0  ;;  %v1443_v42 = vmul.f32 %v1407_v20, %v1407_v20  ;;  %v1409_v5 = vpop.f32.mrb[95].mxu0  ;;  %v1766_v27 = vadd.f32 %v1765_v38, %v1734_v4 }
 0x320   : > { %v1736_v0 = vmax.f32 %v3758_v44, 0.0  ;;  %v1669_v56 = vmul.f32 %v3489_v57, %v1630_v9  ;;  %v1738_v9 = vmax.f32 %v3774_v34, 0.0 }
 0x321   : > { %v2653_v46 = vpop.eup %2652  ;;  %v1538_v23 = vadd.f32 1e-06, %v1506_v32  ;;  %v1475_v45 = vsub.f32 %v1409_v5, %v1443_v42  ;;  %v1600_v5 = vsub.f32 %v3224_v40, %v3698_v12  ;;  %v1767_v16 = vadd.f32 %v1766_v27, %v1735_v11 }
 0x322   : > { %v1631_v50 = vmul.f32 %v2653_v46, %v1599_v63  ;;  %v1737_v42 = vmax.f32 %v3767_v19, 0.0  ;;  %v3783_v63 = vadd.f32 %v3507_v62, %v1668_v13  ;;  %v3790_v40 = vadd.f32 %v3507_v62, %v1669_v56 }
 0x323   : > { %2658 = vrsqrt.f32 %v1538_v23  ;;  %v1507_v28 = vmax.f32 %v1475_v45, 0.0  ;;  %v1768_v30 = vadd.f32 %v1767_v16, %v1736_v0  ;;  %v1601_v23 = vsub.f32 %v3218_v35, %v3720_v17 }
 0x324   : > { %v1670_v46 = vmul.f32 %v3489_v57, %v1631_v50  ;;  %v1739_v50 = vmax.f32 %v3783_v63, 0.0 }
 0x325   : > { %v2655_v36 = vpop.eup %2654  ;;  %v1539_v32 = vadd.f32 1e-06, %v1507_v28  ;;  %v1769_v13 = vadd.f32 %v1768_v30, %v1737_v42 }
 0x326   : > { %v1632_v38 = vmul.f32 %v2655_v36, %v1600_v5  ;;  %v3799_v27 = vadd.f32 %v3507_v62, %v1670_v46  ;;  %v1602_v5 = vsub.f32 %v3236_v48, %v3740_v24  ;;  %v4090_v36 = vmax.f32 %v3790_v40, 0.0 }
 0x327   : > { %2660 = vrsqrt.f32 %v1539_v32  ;;  %v1770_v56 = vadd.f32 %v1769_v13, %v1738_v9 }
 0x328   : > { %v1671_v12 = vmul.f32 %v3489_v57, %v1632_v38  ;;  %v4089_v46 = vmax.f32 %v3799_v27, 0.0 }
 0x329   : > { %v2657_v45 = vpop.eup %2656  ;;  %v1771_v32 = vadd.f32 %v1770_v56, %v1739_v50 }
 0x32a   : > { %v1633_v28 = vmul.f32 %v2657_v45, %v1601_v23  ;;  %v3807_v35 = vadd.f32 %v3507_v62, %v1671_v12  ;;  %v1603_v23 = vsub.f32 %v3231_v43, %v1407_v20 }
 0x32b   : > { %v1772_v24 = vadd.f32 %v1771_v32, %v4090_v36 }
 0x32c   : > { %v1672_v17 = vmul.f32 %v3489_v57, %v1633_v28  ;;  %v4088_v30 = vmax.f32 %v3807_v35, 0.0 }
 0x32d   : > { %v2659_v16 = vpop.eup %2658  ;;  %v1773_v13 = vadd.f32 %v1772_v24, %v4089_v46 }
 0x32e   : > { %v3814_v38 = vadd.f32 %v3507_v62, %v1672_v17  ;;  %v1634_v48 = vmul.f32 %v2659_v16, %v1602_v5 }
 0x32f   : > { %v1774_v5 = vadd.f32 %v1773_v13, %v4088_v30 }
 0x330   : > { %v1673_v12 = vmul.f32 %v3489_v57, %v1634_v48  ;;  %v1743_v28 = vmax.f32 %v3814_v38, 0.0 }
 0x331   : > { %v2661_v45 = vpop.eup %2660 }
 0x332   : > { %v3825_v56 = vadd.f32 %v3507_v62, %v1673_v12  ;;  %v1635_v17 = vmul.f32 %v2661_v45, %v1603_v23  ;;  %v1775_v43 = vadd.f32 %v1774_v5, %v1743_v28 }
 0x334   : > { %v4091_v16 = vmax.f32 %v3825_v56, 0.0  ;;  %v1674_v32 = vmul.f32 %v3489_v57, %v1635_v17  ;;  %v1746_v57 = vld [vmem:[#allocation2] sm:$0x1] }
 0x336   : > { %v3834_v20 = vadd.f32 %v3507_v62, %v1674_v32  ;;  %v1776_v48 = vadd.f32 %v1775_v43, %v4091_v16 }
 0x338   : > { %v4092_v24 = vmax.f32 %v3834_v20, 0.0 }
 0x33a   : > { %v1777_v12 = vadd.f32 %v1776_v48, %v4092_v24 }
 0x33c   : > { %v1778_v23 = vrot.slane %v1777_v12, 4 }
 0x33e   : > { %v1779_v45 = vadd.f32 %v1778_v23, %v1777_v12 }
 0x340   : > { %v1780_v13 = vrot.slane %v1779_v45, 2 }
 0x342   : > { %v1781_v30 = vadd.f32 %v1780_v13, %v1779_v45  ;;  %v2019_v45 = vlaneseq }
 0x344   : > { %v1782_v46 = vrot.slane %v1781_v30, 1 }
 0x346   : > { %v1783_v17 = vadd.f32 %v1782_v46, %v1781_v30 }
 0x348   : > { %v1784_v36 = vadd.f32 %v1783_v17, %v1746_v57 }
 0x34a   : > { %1785 = vst [vmem:[#allocation2] sm:$0x1] %v1784_v36  ;;  %v2020_v36 = vshrl.u32 %v2019_v45, 7 }
 0x34c   : > { %v2021_v46 = vsub.s32 0, %v2020_v36 }
 0x351   : > { %v1818_v62 = vld [vmem:[#allocation2] sm:$0x1] }
 0x352   : > { %2450 = vmatmul.mubr.f32.vlgmr.msra.gmra.mrb[64].mxu1 %v1818_v62 }
 0x425   : > { %v1901_v5 = vpop.f32.mrb[64].mxu1 }
 0x426   : > { %v1905_v32 = vmax.f32 %v1901_v5, 0.0  ;;  %v2451_v43 = vpop.f32.mrb[65].mxu1 }
 0x428   : > { %2455 = vmatmul.mubr.msk.f32.vlgmr.msra.gmra.mrb[96].mxu0 %vm1058_vm1, %v1905_v32 }
 0x4fb   : > { %v1976_v16 = vpop.f32.mrb[96].mxu0 }
 0x4fc   : > { %v2303_v48 = vmul.f32 -1.442695, %v1976_v16  ;;  %v2456_v24 = vpop.f32.mrb[97].mxu0 }
 0x4fe   : > { %2662 = vpow2.f32 %v2303_v48 }
 0x508   : > { %v2663_v12 = vpop.eup %2662 }
 0x509   : > { %v1983_v23 = vadd.f32 1.0, %v2663_v12 }
 0x50b   : > { %2664 = vrcp.f32 %v1983_v23 }
 0x515   : > { %v2665_v30 = vpop.eup %2664 }
 0x516   : > { %v3855_v16 = vrot.slane %v2665_v30, %v2021_v46  ;;  %1986 = vst [vmem:[%s387_s11] sm:$0x1] %v2665_v30 }
 0x517   : > { %2679 = shalt.err (!%p2676_p5)
}
 0x518   : > { %s2680_s11 = scalar_lea.hbm %s3851_s24, 16  ;;  %s2684_s20 = scalar_lea.hbm %s4076_s10, 32 }
 0x519   : > { %p2681_p6 = scmp.ne.s32.totalorder %s3851_s24, %s2680_s11  ;;  %p2685_p10 = scmp.lt.u32.totalorder %s3851_s24, %s4076_s10 }
 0x51a   : > { %p2686_p11 = scmp.lt.u32.totalorder %s2684_s20, %s2680_s11  ;;  %p2688_p13 = scmp.lt.u32.totalorder %s2680_s11, %s3851_s24 }
 0x51b   : > { %p2682_p7 = pnand %p2681_p6, %p2880_p4 }
 0x51c   : > { %p2687_p12 = por %p2686_p11, %p2685_p10 }
 0x51d   : > { %p2683_p9 = pneg %p2682_p7 }
 0x51e   : > { %p2689_p0 = por %p2688_p13, %p2687_p12 }
 0x520   : > { %p2690_p1 = pnand %p2689_p0, %p2683_p9 }
 0x522   : > { %2693 = shalt.err (!%p2690_p1)
}
 0x523   : > { %2534 = dma.vmem_to_hbm [thread:$0]  (%p2880_p4), %s3853_s12, 16, %s3851_s24, %s2093_s27   ;;  %v2023_v24 = vmul.f32 %v3855_v16, %v1714_v51  ;;  %v2024_v13 = vmul.f32 %v3855_v16, %v1715_v55  ;;  %v2025_v57 = vmul.f32 %v3855_v16, %v1716_v22  ;;  %v2026_v17 = vmul.f32 %v3855_v16, %v1717_v15 }
 0x524   : > { %v2027_v62 = vmul.f32 %v3855_v16, %v1718_v59  ;;  %v2028_v60 = vmul.f32 %v3855_v16, %v1719_v8  ;;  %v2029_v58 = vmul.f32 %v3855_v16, %v1720_v18  ;;  %v4099_v49 = vmax.f32 %v3584_v41, 0.0  ;;  %s4104_s1 = sshll.u32 %s3843_s29, 8  ;;  %s2311_s24 = sshll.u32 %s2768_s16, 12 }
 0x525   : > { %v4100_v2 = vmax.f32 %v3598_v26, 0.0  ;;  %v4101_v22 = vmax.f32 %v3608_v39, 0.0  ;;  %v4102_v15 = vmax.f32 %v3622_v14, 0.0  ;;  %v4103_v59 = vmax.f32 %v3632_v47, 0.0  ;;  %s3917_s12 = scalar_lea.vmem [#allocation3], %s4104_s1  ;;  %s3992_s30 = scalar_lea.hbm %s4075_s9, %s2311_s24 }
 0x526   : > { %v2030_v55 = vmul.f32 %v3855_v16, %v4099_v49  ;;  %2055 = vst [vmem:[%s3917_s12] sm:$0xff] %v2023_v24  ;;  %2056 = vst [vmem:[%s3917_s12 + $0x8] sm:$0xff] %v2024_v13  ;;  %v4105_v8 = vmax.f32 %v3648_v53, 0.0  ;;  %v4106_v18 = vmax.f32 %v3660_v7, 0.0  ;;  %v4107_v39 = vmax.f32 %v3672_v10, 0.0  ;;  %s2107_s27 = sshll.u32 %s3917_s12, 4  ;;  %s2088_s11 = scalar_lea.sflag [#allocation4], %s3843_s29  ;;  %s3994_s27 = int_to_ptr.vmem [resolvable:$true] %s2107_s27 }
 0x527   : > { %v2031_v51 = vmul.f32 %v3855_v16, %v4100_v2  ;;  %v2032_v25 = vmul.f32 %v3855_v16, %v4101_v22  ;;  %v2033_v1 = vmul.f32 %v3855_v16, %v4102_v15  ;;  %v2034_v54 = vmul.f32 %v3855_v16, %v4103_v59  ;;  %2057 = vst [vmem:[%s3917_s12 + $0x10] sm:$0xff] %v2025_v57  ;;  %s2694_s19 = scalar_lea.vmem %s3994_s27, 4096  ;;  %s2782_s22 = smov [#allocation3]  }
 0x528   : > { %2058 = vst [vmem:[%s3917_s12 + $0x18] sm:$0xff] %v2026_v17  ;;  %v2035_v41 = vmul.f32 %v3855_v16, %v4105_v8  ;;  %v2036_v26 = vmul.f32 %v3855_v16, %v4106_v18  ;;  %v2037_v14 = vmul.f32 %v3855_v16, %v4107_v39  ;;  %v4108_v47 = vmax.f32 %v3684_v61, 0.0  ;;  %2059 = vst [vmem:[%s3917_s12 + $0x20] sm:$0xff] %v2027_v62  ;;  %p2695_p2 = scmp.ne.s32.totalorder %s3994_s27, %s2694_s19  ;;  %s2698_s20 = sshll.u32 %s2782_s22, 4  ;;  %s2699_s20 = int_to_ptr.vmem [resolvable:$false] %s2698_s20 }
 0x529   : > { %2060 = vst [vmem:[%s3917_s12 + $0x28] sm:$0xff] %v2028_v60  ;;  %2061 = vst [vmem:[%s3917_s12 + $0x30] sm:$0xff] %v2029_v58  ;;  %v4109_v53 = vmax.f32 %v3694_v31, 0.0  ;;  %v4110_v10 = vmax.f32 %v3706_v33, 0.0  ;;  %v2041_v32 = vmul.f32 %v3855_v16, %v1732_v21  ;;  %v2042_v43 = vmul.f32 %v3855_v16, %v1733_v3  ;;  %s2700_s0 = scalar_lea.vmem %s2699_s20, 8192  ;;  %p2701_p6 = scmp.lt.s32.totalorder %s3994_s27, %s2699_s20 }
 0x52a   : > { %v2038_v5 = vmul.f32 %v3855_v16, %v4108_v47  ;;  %2062 = vst [vmem:[%s3917_s12 + $0x38] sm:$0xff] %v2030_v55  ;;  %2063 = vst [vmem:[%s3917_s12 + $0x40] sm:$0xff] %v2031_v51  ;;  %v2043_v31 = vmul.f32 %v3855_v16, %v1734_v4  ;;  %v2044_v33 = vmul.f32 %v3855_v16, %v1735_v11  ;;  %v4111_v6 = vmax.f32 %v3790_v40, 0.0  ;;  %p2696_p3 = pnand %p2695_p2, %p2880_p4  ;;  %p2702_p7 = scmp.lt.s32.totalorder %s2700_s0, %s2694_s19 }
 0x52b   : > { %v2039_v7 = vmul.f32 %v3855_v16, %v4109_v53  ;;  %v2040_v61 = vmul.f32 %v3855_v16, %v4110_v10  ;;  %2064 = vst [vmem:[%s3917_s12 + $0x48] sm:$0xff] %v2032_v25  ;;  %2065 = vst [vmem:[%s3917_s12 + $0x50] sm:$0xff] %v2033_v1  ;;  %v2045_v29 = vmul.f32 %v3855_v16, %v1736_v0  ;;  %v4112_v37 = vmax.f32 %v3799_v27, 0.0 }
 0x52c   : > { %2066 = vst [vmem:[%s3917_s12 + $0x58] sm:$0xff] %v2034_v54  ;;  %v2046_v52 = vmul.f32 %v3855_v16, %v1737_v42  ;;  %2067 = vst [vmem:[%s3917_s12 + $0x60] sm:$0xff] %v2035_v41  ;;  %v2047_v21 = vmul.f32 %v3855_v16, %v1738_v9  ;;  %v2048_v44 = vmul.f32 %v3855_v16, %v1739_v50  ;;  %v4113_v11 = vmax.f32 %v3807_v35, 0.0  ;;  %p2697_p5 = pneg %p2696_p3  ;;  %p2703_p9 = por %p2702_p7, %p2701_p6 }
 0x52d   : > { %2068 = vst [vmem:[%s3917_s12 + $0x68] sm:$0xff] %v2036_v26  ;;  %2069 = vst [vmem:[%s3917_s12 + $0x70] sm:$0xff] %v2037_v14  ;;  %v2049_v3 = vmul.f32 %v3855_v16, %v4111_v6  ;;  %v2050_v4 = vmul.f32 %v3855_v16, %v4112_v37  ;;  %v2052_v0 = vmul.f32 %v3855_v16, %v1743_v28  ;;  %v4114_v34 = vmax.f32 %v3825_v56, 0.0 }
 0x52e   : > { %2070 = vst [vmem:[%s3917_s12 + $0x78] sm:$0xff] %v2038_v5  ;;  %2071 = vst [vmem:[%s3917_s12 + $0x80] sm:$0xff] %v2039_v7  ;;  %v2051_v19 = vmul.f32 %v3855_v16, %v4113_v11  ;;  %v4115_v63 = vmax.f32 %v3834_v20, 0.0  ;;  %p2704_p10 = pnand %p2703_p9, %p2697_p5 }
 0x52f   : > { %2072 = vst [vmem:[%s3917_s12 + $0x88] sm:$0xff] %v2040_v61  ;;  %2073 = vst [vmem:[%s3917_s12 + $0x90] sm:$0xff] %v2041_v32  ;;  %v2053_v42 = vmul.f32 %v3855_v16, %v4114_v34 }
 0x530   : > { %2074 = vst [vmem:[%s3917_s12 + $0x98] sm:$0xff] %v2042_v43  ;;  %v2054_v9 = vmul.f32 %v3855_v16, %v4115_v63  ;;  %2075 = vst [vmem:[%s3917_s12 + $0xa0] sm:$0xff] %v2043_v31 }
 0x531   : > { %2076 = vst [vmem:[%s3917_s12 + $0xa8] sm:$0xff] %v2044_v33  ;;  %2077 = vst [vmem:[%s3917_s12 + $0xb0] sm:$0xff] %v2045_v29 }
 0x532   : > { %2078 = vst [vmem:[%s3917_s12 + $0xb8] sm:$0xff] %v2046_v52  ;;  %2079 = vst [vmem:[%s3917_s12 + $0xc0] sm:$0xff] %v2047_v21 }
 0x533   : > { %2080 = vst [vmem:[%s3917_s12 + $0xc8] sm:$0xff] %v2048_v44  ;;  %2081 = vst [vmem:[%s3917_s12 + $0xd0] sm:$0xff] %v2049_v3 }
 0x534   : > { %2082 = vst [vmem:[%s3917_s12 + $0xd8] sm:$0xff] %v2050_v4  ;;  %2083 = vst [vmem:[%s3917_s12 + $0xe0] sm:$0xff] %v2051_v19 }
 0x535   : > { %2084 = vst [vmem:[%s3917_s12 + $0xe8] sm:$0xff] %v2052_v0  ;;  %2085 = vst [vmem:[%s3917_s12 + $0xf0] sm:$0xff] %v2053_v42 }
 0x536   : > { %2086 = vst [vmem:[%s3917_s12 + $0xf8] sm:$0xff] %v2054_v9 }
 0x537   : > { %2707 = shalt.err (!%p2704_p10)
}
 0x538   : > { %s2708_s1 = scalar_lea.hbm %s3992_s30, 4096  ;;  %s2712_s16 = scalar_lea.hbm %s4075_s9, 8192 }
 0x539   : > { %p2709_p11 = scmp.ne.s32.totalorder %s3992_s30, %s2708_s1  ;;  %p2713_p0 = scmp.lt.u32.totalorder %s3992_s30, %s4075_s9 }
 0x53a   : > { %p2714_p1 = scmp.lt.u32.totalorder %s2712_s16, %s2708_s1  ;;  %p2716_p3 = scmp.lt.u32.totalorder %s2708_s1, %s3992_s30 }
 0x53b   : > { %p2710_p12 = pnand %p2709_p11, %p2880_p4 }
 0x53c   : > { %p2715_p2 = por %p2714_p1, %p2713_p0 }
 0x53d   : > { %p2711_p13 = pneg %p2710_p12 }
 0x53e   : > { %p2717_p5 = por %p2716_p3, %p2715_p2 }
 0x540   : > { %p2718_p6 = pnand %p2717_p5, %p2711_p13 }
 0x542   : > { %2721 = shalt.err (!%p2718_p6)
}
 0x543   : > { %s2783_s19 = smov 128   ;;  %s2784_s20 = smov 8  }
 0x544   : > { %2533 = dma.vmem_to_hbm [thread:$0]  (%p2880_p4), %s3994_s27, 4096, %s3992_s30, %s2088_s11, %s2783_s19, %s2783_s19, %s2784_s20  }
 0x545 PF: > { %p2544_p7 = scmp.ge.s32.totalorder %s2776_s18, 2  ;;  %s2135_s0 = sand.u32 1, %s2756_s13  }
 0x546   : > { %s2136_s1 = scalar_lea.sflag [#allocation4], %s2135_s0 }
 0x547   : > { %p2538_p9 = pnand %p2544_p7, %p2887_p8 }
 0x549   : > { %2747 = dma.done.wait (!%p2538_p9), %s2136_s1, 4096  }
 0x54a   : > { %2749 = vsyncadd (!%p2538_p9), %s2136_s1, 4294963200  ;;  %s2145_s12 = scalar_lea.sflag [#allocation6], %s2135_s0 }
 0x54b   : > { %2751 = dma.done.wait (!%p2538_p9), %s2145_s12, 16  }
 0x54c   : > { %2753 = vsyncadd (!%p2538_p9), %s2145_s12, 4294967280  ;;  %s27_s18 = sadd.s32 1, %s2776_s18   ;;  %s4116_s13 = smov %s2760_s14 }
 0x54d   : > { %p24_p10 = scmp.ge.s32.totalorder %s27_s18, 4   ;;  %s4117_s14 = smov %s2764_s15 }
 0x54e   : > { %s4118_s15 = smov %s2893_s26  ;;  %s4119_s16 = smov %s2772_s17 }
 0x54f   : > { %s4120_s17 = smov %s4122_s21  ;;  %26 = sbr.rel (!%p24_p10) target bundleno = 9 (0x9), region = 112 }
 0x556   :  { %2149 = vsyncpa [#allocation4], 1 }
 0x557   :  { %2151 = vsyncpa [#allocation4 + $0x1], 1 }
 0x558   :  { %2152 = vsyncpa [#allocation6], 1 }
 0x559   :  { %2154 = vsyncpa [#allocation6 + $0x1], 1 }

</bundles_post_ra>
